<compile_context>
chip_gen: v6e
topology: v6e:2x2x1
jax: 0.10.0
libtpu: 0.0.40
codegen_flags: <defaults>
</compile_context>

<pallas_src>
import functools

import jax
import jax.numpy as jnp
import numpy as np
from jax.experimental import pallas as pl
from jax.experimental.pallas import tpu as pltpu


def _fused_block_kernel(x_ref, w1_ref, w2_ref, o_ref, hp_ref, *,
                        H, W, Cin, hdim, odim, Ho, Wo):
    """One batch element: conv3x3(s1,p1)+ReLU -> conv3x3(s2,p1)+ReLU, all in VMEM."""
    # ---------------- conv1: 3x3, stride 1, pad 1, + ReLU ----------------
    xp = x_ref[...]                                        # (H+2, W+2, Cin) zero-padded NHWC
    taps1 = []
    for ky in range(3):
        for kx in range(3):
            t = xp[ky:ky + H, kx:kx + W, :]                # (H, W, Cin) static slice
            taps1.append(t.reshape(H * W, Cin))
    p1 = jnp.concatenate(taps1, axis=1)                    # (H*W, 9*Cin) in-register im2col
    h = jnp.dot(p1, w1_ref[...], preferred_element_type=jnp.float32)   # (H*W, hdim)
    h = jnp.maximum(h, 0.0)

    # Fused convs: padded intermediate stays in VMEM.  Zero the halo every step
    # (scratch persists across grid steps / megacore splits — do NOT gate on pid==0).
    hp_ref[...] = jnp.zeros_like(hp_ref)
    hp_ref[1:H + 1, 1:W + 1, :] = h.reshape(H, W, hdim)

    # ---------------- conv2: 3x3, stride 2, pad 1, + ReLU ----------------
    taps2 = []
    for ky in range(3):
        for kx in range(3):
            t = hp_ref[pl.ds(ky, Ho, 2), pl.ds(kx, Wo, 2), :]   # (Ho, Wo, hdim) stride-2 window
            taps2.append(t.reshape(Ho * Wo, hdim))
    p2 = jnp.concatenate(taps2, axis=1)                    # (Ho*Wo, 9*hdim)
    y = jnp.dot(p2, w2_ref[...], preferred_element_type=jnp.float32)   # (Ho*Wo, odim)
    y = jnp.maximum(y, 0.0)

    # Channel-major store: lane width Ho*Wo (lane dense) and output is NCHW already.
    o_ref[...] = y.T.astype(o_ref.dtype)                   # (odim, Ho*Wo)


def srt_conv_block(x_nchw, w1_oihw, w2_oihw):
    """Forward of SRTConvBlock. x: (N, idim, H, W) -> (N, odim, ceil(H/2), ceil(W/2))."""
    N, Cin, H, W = x_nchw.shape
    hdim = w1_oihw.shape[0]
    odim = w2_oihw.shape[0]
    Ho = (H - 1) // 2 + 1                                   # 3x3, stride 2, pad 1
    Wo = (W - 1) // 2 + 1

    # NCHW -> padded NHWC once in the wrapper (channels on the lane axis in-kernel).
    xp = jnp.pad(jnp.transpose(x_nchw, (0, 2, 3, 1)),
                 ((0, 0), (1, 1), (1, 1), (0, 0)))

    # OIHW -> row index ((ky*3+kx)*C + c): matches the tap-concat order in the kernel.
    w1f = jnp.transpose(w1_oihw, (2, 3, 1, 0)).reshape(9 * Cin, hdim)
    w2f = jnp.transpose(w2_oihw, (2, 3, 1, 0)).reshape(9 * hdim, odim)

    kernel = functools.partial(_fused_block_kernel, H=H, W=W, Cin=Cin, hdim=hdim,
                               odim=odim, Ho=Ho, Wo=Wo)

    itemsize = np.dtype(x_nchw.dtype).itemsize
    flops = 2 * N * (H * W * 9 * Cin * hdim + Ho * Wo * 9 * hdim * odim)
    bytes_accessed = itemsize * (N * (H + 2) * (W + 2) * Cin
                                 + 9 * Cin * hdim + 9 * hdim * odim
                                 + N * odim * Ho * Wo)

    out = pl.pallas_call(
        kernel,
        out_shape=jax.ShapeDtypeStruct((N, odim, Ho * Wo), x_nchw.dtype),
        grid_spec=pltpu.PrefetchScalarGridSpec(
            num_scalar_prefetch=0,
            grid=(N,),                                          # one image per grid step
            in_specs=[
                pl.BlockSpec((None, H + 2, W + 2, Cin), lambda n: (n, 0, 0, 0)),
                pl.BlockSpec((9 * Cin, hdim), lambda n: (0, 0)),   # weights stay VMEM-resident
                pl.BlockSpec((9 * hdim, odim), lambda n: (0, 0)),
            ],
            out_specs=pl.BlockSpec((None, odim, Ho * Wo), lambda n: (n, 0, 0)),
            scratch_shapes=[pltpu.VMEM((H + 2, W + 2, hdim), jnp.float32)],
        ),
        compiler_params=pltpu.CompilerParams(
            dimension_semantics=("parallel",)),                 # megacore: split batch
        cost_estimate=pl.CostEstimate(flops=flops, transcendentals=0,
                                      bytes_accessed=bytes_accessed),
    )(xp, w1f, w2f)

    return out.reshape(N, odim, Ho, Wo)                         # free reshape -> NCHW


def _reference_block(x, w1, w2):
    dn = ('NCHW', 'OIHW', 'NCHW')
    h = jax.lax.conv_general_dilated(x, w1, (1, 1), ((1, 1), (1, 1)),
                                     dimension_numbers=dn)
    h = jnp.maximum(h, 0.0)
    y = jax.lax.conv_general_dilated(h, w2, (2, 2), ((1, 1), (1, 1)),
                                     dimension_numbers=dn)
    return jnp.maximum(y, 0.0)


if __name__ == "__main__":
    # SRTConvBlock(idim=4) -> hdim=4, odim=2*hdim=8
    idim, hdim, odim = 4, 4, 8
    N, H, W = 2, 16, 16

    key = jax.random.PRNGKey(0)
    kx_, k1, k2 = jax.random.split(key, 3)
    x = jax.random.normal(kx_, (N, idim, H, W), dtype=jnp.float32)
    # Deterministic Kaiming-style init for Conv2d weights (bias=False), OIHW layout.
    w1 = jax.random.normal(k1, (hdim, idim, 3, 3), jnp.float32) * np.sqrt(2.0 / (idim * 9))
    w2 = jax.random.normal(k2, (odim, hdim, 3, 3), jnp.float32) * np.sqrt(2.0 / (hdim * 9))

    out = jax.block_until_ready(srt_conv_block(x, w1, w2))
    assert out.shape == (N, odim, H // 2, W // 2), out.shape

    ref = jax.block_until_ready(_reference_block(x, w1, w2))
    np.testing.assert_allclose(np.asarray(out), np.asarray(ref), rtol=1e-3, atol=1e-3)

    print("KERNEL_OK")
</pallas_src>

<mosaic_0001>
module attributes {stable_mosaic.version = 11 : i64} {
  func.func @_fused_block_kernel(%arg0: i32, %arg1: memref<1x18x18x4xf32, #tpu.memory_space<vmem>>, %arg2: memref<36x4xf32, #tpu.memory_space<vmem>>, %arg3: memref<36x8xf32, #tpu.memory_space<vmem>>, %arg4: memref<1x8x64xf32, #tpu.memory_space<vmem>>, %arg5: memref<18x18x4xf32, #tpu.memory_space<vmem>>) attributes {dimension_semantics = [#tpu.dimension_semantics<parallel>], iteration_bounds = array<i64: 2>, scalar_prefetch = 0 : i64, scratch_operands = 1 : i64, tpu.core_type = #tpu.core_type<tc>, window_params = [{transform_indices = @transform_0, window_bounds = array<i64: 1, 18, 18, 4>}, {pipeline_mode = #tpu.pipeline_mode<synchronous>, transform_indices = @transform_1, window_bounds = array<i64: 36, 4>}, {pipeline_mode = #tpu.pipeline_mode<synchronous>, transform_indices = @transform_2, window_bounds = array<i64: 36, 8>}, {transform_indices = @transform_3, window_bounds = array<i64: 1, 8, 64>}]} {
    %c0 = arith.constant 0 : index
    %c0_0 = arith.constant 0 : index
    %c0_1 = arith.constant 0 : index
    %c0_2 = arith.constant 0 : index
    %0 = vector.load %arg1[%c0, %c0_0, %c0_1, %c0_2] : memref<1x18x18x4xf32, #tpu.memory_space<vmem>>, vector<1x18x18x4xf32>
    %1 = vector.shape_cast %0 : vector<1x18x18x4xf32> to vector<18x18x4xf32>
    %2 = vector.extract_strided_slice %1 {offsets = [0, 0, 0], sizes = [16, 16, 4], strides = [1, 1, 1]} : vector<18x18x4xf32> to vector<16x16x4xf32>
    %3 = vector.shape_cast %2 : vector<16x16x4xf32> to vector<256x4xf32>
    %4 = vector.extract_strided_slice %1 {offsets = [0, 1, 0], sizes = [16, 16, 4], strides = [1, 1, 1]} : vector<18x18x4xf32> to vector<16x16x4xf32>
    %5 = vector.shape_cast %4 : vector<16x16x4xf32> to vector<256x4xf32>
    %6 = vector.extract_strided_slice %1 {offsets = [0, 2, 0], sizes = [16, 16, 4], strides = [1, 1, 1]} : vector<18x18x4xf32> to vector<16x16x4xf32>
    %7 = vector.shape_cast %6 : vector<16x16x4xf32> to vector<256x4xf32>
    %8 = vector.extract_strided_slice %1 {offsets = [1, 0, 0], sizes = [16, 16, 4], strides = [1, 1, 1]} : vector<18x18x4xf32> to vector<16x16x4xf32>
    %9 = vector.shape_cast %8 : vector<16x16x4xf32> to vector<256x4xf32>
    %10 = vector.extract_strided_slice %1 {offsets = [1, 1, 0], sizes = [16, 16, 4], strides = [1, 1, 1]} : vector<18x18x4xf32> to vector<16x16x4xf32>
    %11 = vector.shape_cast %10 : vector<16x16x4xf32> to vector<256x4xf32>
    %12 = vector.extract_strided_slice %1 {offsets = [1, 2, 0], sizes = [16, 16, 4], strides = [1, 1, 1]} : vector<18x18x4xf32> to vector<16x16x4xf32>
    %13 = vector.shape_cast %12 : vector<16x16x4xf32> to vector<256x4xf32>
    %14 = vector.extract_strided_slice %1 {offsets = [2, 0, 0], sizes = [16, 16, 4], strides = [1, 1, 1]} : vector<18x18x4xf32> to vector<16x16x4xf32>
    %15 = vector.shape_cast %14 : vector<16x16x4xf32> to vector<256x4xf32>
    %16 = vector.extract_strided_slice %1 {offsets = [2, 1, 0], sizes = [16, 16, 4], strides = [1, 1, 1]} : vector<18x18x4xf32> to vector<16x16x4xf32>
    %17 = vector.shape_cast %16 : vector<16x16x4xf32> to vector<256x4xf32>
    %18 = vector.extract_strided_slice %1 {offsets = [2, 2, 0], sizes = [16, 16, 4], strides = [1, 1, 1]} : vector<18x18x4xf32> to vector<16x16x4xf32>
    %19 = vector.shape_cast %18 : vector<16x16x4xf32> to vector<256x4xf32>
    %20 = tpu.concatenate %3, %5, %7, %9, %11, %13, %15, %17, %19 in 1 : vector<256x4xf32>, vector<256x4xf32>, vector<256x4xf32>, vector<256x4xf32>, vector<256x4xf32>, vector<256x4xf32>, vector<256x4xf32>, vector<256x4xf32>, vector<256x4xf32> -> vector<256x36xf32>
    %c0_3 = arith.constant 0 : index
    %c0_4 = arith.constant 0 : index
    %21 = vector.load %arg2[%c0_3, %c0_4] : memref<36x4xf32, #tpu.memory_space<vmem>>, vector<36x4xf32>
    %cst = arith.constant dense<0.000000e+00> : vector<256x4xf32>
    %22 = tpu.matmul %20, %21, %cst {dimension_numbers = #tpu.dot_dimension_numbers<[1], [0], [0], [1], [0, 0, 1, 1], [], []>} : vector<256x36xf32>, vector<36x4xf32>, vector<256x4xf32> -> vector<256x4xf32>
    %cst_5 = arith.constant 0.000000e+00 : f32
    %23 = vector.broadcast %cst_5 : f32 to vector<256x4xf32>
    %24 = arith.maximumf %22, %23 : vector<256x4xf32>
    %cst_6 = arith.constant 0.000000e+00 : f32
    %25 = vector.broadcast %cst_6 : f32 to vector<18x18x4xf32>
    %c0_7 = arith.constant 0 : index
    %c0_8 = arith.constant 0 : index
    %c0_9 = arith.constant 0 : index
    %26 = vector.load %arg5[%c0_7, %c0_8, %c0_9] : memref<18x18x4xf32, #tpu.memory_space<vmem>>, vector<18x18x4xf32>
    tpu.vector_store %arg5[%c0_7, %c0_8, %c0_9], %25 {strides = array<i32>} : memref<18x18x4xf32, #tpu.memory_space<vmem>>, vector<18x18x4xf32>,
    %27 = vector.shape_cast %24 : vector<256x4xf32> to vector<16x16x4xf32>
    %c1 = arith.constant 1 : index
    %c1_10 = arith.constant 1 : index
    %c0_11 = arith.constant 0 : index
    %28 = vector.load %arg5[%c1, %c1_10, %c0_11] : memref<18x18x4xf32, #tpu.memory_space<vmem>>, vector<16x16x4xf32>
    tpu.vector_store %arg5[%c1, %c1_10, %c0_11], %27 {strides = array<i32>} : memref<18x18x4xf32, #tpu.memory_space<vmem>>, vector<16x16x4xf32>,
    %c0_12 = arith.constant 0 : index
    %c0_13 = arith.constant 0 : index
    %c0_14 = arith.constant 0 : index
    %29 = tpu.strided_load %arg5[%c0_12, %c0_13, %c0_14] {strides = array<i32: 2, 2, 1>} : memref<18x18x4xf32, #tpu.memory_space<vmem>>, vector<8x8x4xf32>
    %30 = vector.shape_cast %29 : vector<8x8x4xf32> to vector<64x4xf32>
    %c0_15 = arith.constant 0 : index
    %c1_16 = arith.constant 1 : index
    %c0_17 = arith.constant 0 : index
    %31 = tpu.strided_load %arg5[%c0_15, %c1_16, %c0_17] {strides = array<i32: 2, 2, 1>} : memref<18x18x4xf32, #tpu.memory_space<vmem>>, vector<8x8x4xf32>
    %32 = vector.shape_cast %31 : vector<8x8x4xf32> to vector<64x4xf32>
    %c0_18 = arith.constant 0 : index
    %c2 = arith.constant 2 : index
    %c0_19 = arith.constant 0 : index
    %33 = tpu.strided_load %arg5[%c0_18, %c2, %c0_19] {strides = array<i32: 2, 2, 1>} : memref<18x18x4xf32, #tpu.memory_space<vmem>>, vector<8x8x4xf32>
    %34 = vector.shape_cast %33 : vector<8x8x4xf32> to vector<64x4xf32>
    %c1_20 = arith.constant 1 : index
    %c0_21 = arith.constant 0 : index
    %c0_22 = arith.constant 0 : index
    %35 = tpu.strided_load %arg5[%c1_20, %c0_21, %c0_22] {strides = array<i32: 2, 2, 1>} : memref<18x18x4xf32, #tpu.memory_space<vmem>>, vector<8x8x4xf32>
    %36 = vector.shape_cast %35 : vector<8x8x4xf32> to vector<64x4xf32>
    %c1_23 = arith.constant 1 : index
    %c1_24 = arith.constant 1 : index
    %c0_25 = arith.constant 0 : index
    %37 = tpu.strided_load %arg5[%c1_23, %c1_24, %c0_25] {strides = array<i32: 2, 2, 1>} : memref<18x18x4xf32, #tpu.memory_space<vmem>>, vector<8x8x4xf32>
    %38 = vector.shape_cast %37 : vector<8x8x4xf32> to vector<64x4xf32>
    %c1_26 = arith.constant 1 : index
    %c2_27 = arith.constant 2 : index
    %c0_28 = arith.constant 0 : index
    %39 = tpu.strided_load %arg5[%c1_26, %c2_27, %c0_28] {strides = array<i32: 2, 2, 1>} : memref<18x18x4xf32, #tpu.memory_space<vmem>>, vector<8x8x4xf32>
    %40 = vector.shape_cast %39 : vector<8x8x4xf32> to vector<64x4xf32>
    %c2_29 = arith.constant 2 : index
    %c0_30 = arith.constant 0 : index
    %c0_31 = arith.constant 0 : index
    %41 = tpu.strided_load %arg5[%c2_29, %c0_30, %c0_31] {strides = array<i32: 2, 2, 1>} : memref<18x18x4xf32, #tpu.memory_space<vmem>>, vector<8x8x4xf32>
    %42 = vector.shape_cast %41 : vector<8x8x4xf32> to vector<64x4xf32>
    %c2_32 = arith.constant 2 : index
    %c1_33 = arith.constant 1 : index
    %c0_34 = arith.constant 0 : index
    %43 = tpu.strided_load %arg5[%c2_32, %c1_33, %c0_34] {strides = array<i32: 2, 2, 1>} : memref<18x18x4xf32, #tpu.memory_space<vmem>>, vector<8x8x4xf32>
    %44 = vector.shape_cast %43 : vector<8x8x4xf32> to vector<64x4xf32>
    %c2_35 = arith.constant 2 : index
    %c2_36 = arith.constant 2 : index
    %c0_37 = arith.constant 0 : index
    %45 = tpu.strided_load %arg5[%c2_35, %c2_36, %c0_37] {strides = array<i32: 2, 2, 1>} : memref<18x18x4xf32, #tpu.memory_space<vmem>>, vector<8x8x4xf32>
    %46 = vector.shape_cast %45 : vector<8x8x4xf32> to vector<64x4xf32>
    %47 = tpu.concatenate %30, %32, %34, %36, %38, %40, %42, %44, %46 in 1 : vector<64x4xf32>, vector<64x4xf32>, vector<64x4xf32>, vector<64x4xf32>, vector<64x4xf32>, vector<64x4xf32>, vector<64x4xf32>, vector<64x4xf32>, vector<64x4xf32> -> vector<64x36xf32>
    %c0_38 = arith.constant 0 : index
    %c0_39 = arith.constant 0 : index
    %48 = vector.load %arg3[%c0_38, %c0_39] : memref<36x8xf32, #tpu.memory_space<vmem>>, vector<36x8xf32>
    %cst_40 = arith.constant dense<0.000000e+00> : vector<64x8xf32>
    %49 = tpu.matmul %47, %48, %cst_40 {dimension_numbers = #tpu.dot_dimension_numbers<[1], [0], [0], [1], [0, 0, 1, 1], [], []>} : vector<64x36xf32>, vector<36x8xf32>, vector<64x8xf32> -> vector<64x8xf32>
    %cst_41 = arith.constant 0.000000e+00 : f32
    %50 = vector.broadcast %cst_41 : f32 to vector<64x8xf32>
    %51 = arith.maximumf %49, %50 : vector<64x8xf32>
    %52 = tpu.transpose %51, [1, 0] : vector<64x8xf32> -> vector<8x64xf32>
    %c0_42 = arith.constant 0 : index
    %c0_43 = arith.constant 0 : index
    %c0_44 = arith.constant 0 : index
    %53 = vector.load %arg4[%c0_42, %c0_43, %c0_44] : memref<1x8x64xf32, #tpu.memory_space<vmem>>, vector<1x8x64xf32>
    %54 = vector.shape_cast %53 : vector<1x8x64xf32> to vector<8x64xf32>
    %55 = vector.shape_cast %52 : vector<8x64xf32> to vector<1x8x64xf32>
    tpu.vector_store %arg4[%c0_42, %c0_43, %c0_44], %55 {strides = array<i32>} : memref<1x8x64xf32, #tpu.memory_space<vmem>>, vector<1x8x64xf32>,
    return
  }
  func.func @transform_0(%arg0: i32) -> (i32, i32, i32, i32) {
    %c0_i32 = arith.constant 0 : i32
    %c0_i32_0 = arith.constant 0 : i32
    %c0_i32_1 = arith.constant 0 : i32
    %c0_i32_2 = arith.constant 0 : i32
    return %arg0, %c0_i32, %c0_i32_0, %c0_i32_1 : i32, i32, i32, i32
  }
  func.func @transform_1(%arg0: i32) -> (i32, i32) {
    %c0_i32 = arith.constant 0 : i32
    %c0_i32_0 = arith.constant 0 : i32
    %c0_i32_1 = arith.constant 0 : i32
    return %c0_i32, %c0_i32_0 : i32, i32
  }
  func.func @transform_2(%arg0: i32) -> (i32, i32) {
    %c0_i32 = arith.constant 0 : i32
    %c0_i32_0 = arith.constant 0 : i32
    %c0_i32_1 = arith.constant 0 : i32
    return %c0_i32, %c0_i32_0 : i32, i32
  }
  func.func @transform_3(%arg0: i32) -> (i32, i32, i32) {
    %c0_i32 = arith.constant 0 : i32
    %c0_i32_0 = arith.constant 0 : i32
    %c0_i32_1 = arith.constant 0 : i32
    return %arg0, %c0_i32, %c0_i32_0 : i32, i32, i32
  }
}

</mosaic_0001>

<bundles_post_ra>
// kernel: tpu_custom_call.1
= control target key start
LH: loop header
LB: loop body
LE: loop exit
PB: predicated region body
PF: predicated region fallthrough
CT: control target
= control target key end

     0   :  { %8 = vsyncpa [#allocation4], 0  ;;  %s4941_s0 = inlined_call_operand.vmem [shape: f32[2,18,18,4], index: 0, kind: input, shape index: {}]   ;;  %s4942_s1 = inlined_call_operand.vmem [shape: f32[36,4], index: 1, kind: input, shape index: {}]   ;;  %s4943_s2 = inlined_call_operand.vmem [shape: f32[36,8], index: 2, kind: input, shape index: {}]   ;;  %s4944_s3 = inlined_call_operand.hbm [shape: f32[2,8,64], index: 3, kind: output, shape index: {}]  }
   0x1   :  { %10 = vsyncpa [#allocation4 + $0x1], 0  ;;  %s3062_s12 = smov 0   ;;  %s3064_s13 = smov 0  }
   0x2   :  { %s3066_s14 = smov 0   ;;  %s3068_s15 = smov 0  }
   0x3 LB: > { %s3083_s16 = sadd.s32 4294967295, %s3030_s15   ;;  %s2702_s17 = sadd.s32 4294967294, %s3030_s15   ;;  %s3030_s15 = sphi %s3068_s15, %s5030_s15   ;;  %s3026_s14 = sphi %s3066_s14, %s5029_s14   ;;  %s3022_s13 = sphi %s3064_s13, %s5028_s13   ;;  %s3018_s12 = sphi %s3062_s12, %s5027_s12  }
   0x4   : > { %s3087_s18 = sadd.s32 1, %s3030_s15   ;;  %s91_s19 = sadd.s32 1, %s3026_s14 }
   0x5   : > { %s88_s20 = ssub.s32 %s3030_s15, %s3087_s18  ;;  %p101_p0 = scmp.ne.s32.totalorder %s3026_s14, %s3022_s13 }
   0x6   : > { %p89_p1 = scmp.eq.s32.totalorder %s88_s20, 0  ;;  %p102_p2 = scmp.eq.s32.totalorder %s3083_s16, 1 }
   0x7   : > { %p107_p3 = scmp.ne.s32.totalorder %s3022_s13, %s3018_s12  ;;  %p108_p4 = scmp.eq.s32.totalorder %s2702_s17, 1 }
   0x8   : > { %s3098_s21 = scalar_select %p89_p1, %s3026_s14, %s91_s19  }
   0x9   : > { %p3100_p5 = por %p102_p2, %p101_p0  ;;  %p3104_p6 = por %p108_p4, %p107_p3 }
   0xa   : > { %p2705_p7 = scmp.ge.s32.totalorder %s3030_s15, 1  ;;  %p140_p8 = scmp.lt.s32.totalorder %s3030_s15, 3 }
   0xc   : > { %p141_p9 = pnand %p2705_p7, %p140_p8 }
   0xe   : > { %144 = sbr.rel (%p141_p9) target bundleno = 1308 (0x51c), region = 32 }
  0x13   : > { %p164_p10 = scmp.lt.s32.totalorder %s3083_s16, 1  ;;  %vm271_vm0 = vcmask 1046528   ;;  %s3032_s29 = smov 4   ;;  %vm352_vm1 = vcmask 1045504   ;;  %vm1593_vm2 = vcmask 1043456   ;;  %vm1227_vm3 = vcmask 31744  }
  0x14   : > { %s3033_s30 = smov 8   ;;  %s3034_s4 = smov 12   ;;  %vm1260_vm4 = vcmask 64512   ;;  %vm1293_vm5 = vcmask 97280   ;;  %vm1326_vm6 = vcmask 130048   ;;  %vm1359_vm7 = vcmask 162816  }
  0x15   : > { %s165_s24 = scalar_select %p164_p10, %s3083_s16, 1  ;;  %vm1392_vm8 = vcmask 195584   ;;  %vm1425_vm9 = vcmask 228352   ;;  %vm1458_vm10 = vcmask 261120   ;;  %vm1496_vm11 = vcmask 293888  }
  0x16   : > { %s3035_s5 = smov 16   ;;  %s3036_s6 = smov 20   ;;  %vm1856_vm12 = vcmask 25600   ;;  %vm2581_vm13 = vcmask 523264  }
  0x17   : > { %s2894_s25 = smul.u32 432, %s165_s24  ;;  %s3037_s7 = smov 24  }
  0x18   : > { %s3038_s20 = smov 28   ;;  %s3039_s8 = smov 32  }
  0x19   : > { %s3115_s28 = scalar_lea.vmem %s4941_s0, %s2894_s25  ;;  %s3041_s10 = smov [#allocation3]  }
  0x1a   : > { %v3118_v0 = vld [vmem:[%s3115_s28 + $0x18] sm:$0xff]  ;;  %v3121_v1 = vld [vmem:[%s3115_s28 + $0x20] sm:$0xff]  ;;  %v3129_v5 = vld [vmem:[%s3115_s28 + $0x8] sm:$0xff]  ;;  %s2974_s11 = sshll.u32 %s3041_s10, 4  ;;  %s2975_s11 = int_to_ptr.vmem [resolvable:$false] %s2974_s11 }
  0x1b   : > { %v3124_v2 = vld [vmem:[%s3115_s28] sm:$0xff]  ;;  %v277_v3 = vrot.slane %v3118_v0, 1  ;;  %v278_v4 = vrot.slane %v3121_v1, 1  ;;  %v3133_v7 = vld [vmem:[%s3115_s28 + $0x28] sm:$0x3]  ;;  %v273_v8 = vrot.slane %v3129_v5, 1 }
  0x1c   : > { %v272_v6 = vrot.slane %v3124_v2, 1  ;;  %v280_v9 = vrot.slane %v3133_v7, 1  ;;  %v3138_v10 = vld [vmem:[%s3115_s28 + $0x10] sm:$0x3]  ;;  %v3141_v11 = vld [vmem:[%s3115_s28 + $0x38] sm:$0xff]  ;;  %v3171_v24 = vld [vmem:[%s3115_s28 + $0x48] sm:$0xff] }
  0x1d   : > { %v3144_v12 = vsel %vm271_vm0, %v277_v3, %v278_v4  ;;  %v275_v13 = vrot.slane %v3138_v10, 1  ;;  %v3148_v14 = vld [vmem:[%s3115_s28 + $0x40] sm:$0x3]  ;;  %v3151_v15 = vld [vmem:[%s3115_s28 + $0x30] sm:$0xff]  ;;  %v283_v18 = vrot.slane %v3141_v11, 1  ;;  %v287_v29 = vrot.slane %v3171_v24, 1 }
  0x1e   : > { %463 = vrot.lane.b32.xlu1 %v3144_v12, %s3032_s29  ;;  %v274_v16 = vsel %vm271_vm0, %v272_v6, %v273_v8  ;;  %v3158_v17 = vsel %vm271_vm0, %v278_v4, %v280_v9  ;;  %v285_v19 = vrot.slane %v3148_v14, 1  ;;  %v282_v21 = vrot.slane %v3151_v15, 1  ;;  %v3165_v22 = vld [vmem:[%s3115_s28 + $0x50] sm:$0xff]  ;;  %v3168_v23 = vld [vmem:[%s3115_s28 + $0x58] sm:$0x3]  ;;  %v3186_v30 = vld [vmem:[%s3115_s28 + $0x68] sm:$0xff] }
  0x1f   : > { %459 = vrot.lane.b32.xlu0 %v274_v16, %s3032_s29  ;;  %v276_v20 = vsel %vm271_vm0, %v273_v8, %v275_v13  ;;  %v288_v26 = vrot.slane %v3165_v22, 1  ;;  %v290_v27 = vrot.slane %v3168_v23, 1  ;;  %v3189_v31 = vld [vmem:[%s3115_s28 + $0x70] sm:$0x3]  ;;  %v3192_v32 = vld [vmem:[%s3115_s28 + $0x60] sm:$0xff]  ;;  %v293_v34 = vrot.slane %v3186_v30, 1 }
  0x20   : > { %v3177_v25 = vsel %vm271_vm0, %v283_v18, %v285_v19  ;;  %v3182_v28 = vsel %vm271_vm0, %v282_v21, %v283_v18  ;;  %v295_v35 = vrot.slane %v3189_v31, 1  ;;  %v292_v37 = vrot.slane %v3192_v32, 1  ;;  %v3208_v38 = vld [vmem:[%s3115_s28 + $0x80] sm:$0xff]  ;;  %v3211_v39 = vld [vmem:[%s3115_s28 + $0x88] sm:$0x3]  ;;  %v3214_v40 = vld [vmem:[%s3115_s28 + $0x78] sm:$0xff] }
  0x21   : > { %v3199_v33 = vsel %vm271_vm0, %v288_v26, %v290_v27  ;;  %v3204_v36 = vsel %vm271_vm0, %v287_v29, %v288_v26  ;;  %v298_v42 = vrot.slane %v3208_v38, 1  ;;  %v300_v43 = vrot.slane %v3211_v39, 1  ;;  %v3230_v46 = vld [vmem:[%s3115_s28 + $0x98] sm:$0xff]  ;;  %v3233_v47 = vld [vmem:[%s3115_s28 + $0xa0] sm:$0x3]  ;;  %v3236_v48 = vld [vmem:[%s3115_s28 + $0x90] sm:$0xff] }
  0x22   : > { %465 = vrot.lane.b32.xlu1 %v3158_v17, %s3032_s29  ;;  %v3221_v41 = vsel %vm271_vm0, %v293_v34, %v295_v35  ;;  %v3226_v44 = vsel %vm271_vm0, %v292_v37, %v293_v34  ;;  %v297_v45 = vrot.slane %v3214_v40, 1  ;;  %v303_v50 = vrot.slane %v3230_v46, 1  ;;  %v3252_v54 = vld [vmem:[%s3115_s28 + $0xb0] sm:$0xff]  ;;  %v3255_v55 = vld [vmem:[%s3115_s28 + $0xb8] sm:$0x3]  ;;  %v3258_v56 = vld [vmem:[%s3115_s28 + $0xa8] sm:$0xff] }
  0x23   : > { %461 = vrot.lane.b32.xlu0 %v276_v20, %s3032_s29  ;;  %v3243_v49 = vsel %vm271_vm0, %v298_v42, %v300_v43  ;;  %v305_v51 = vrot.slane %v3233_v47, 1  ;;  %v302_v53 = vrot.slane %v3236_v48, 1  ;;  %v308_v58 = vrot.slane %v3252_v54, 1  ;;  %v3274_v62 = vld [vmem:[%s3115_s28 + $0xc8] sm:$0xff]  ;;  %v3277_v63 = vld [vmem:[%s3115_s28 + $0xd0] sm:$0x3] }
  0x24   : > { %v3248_v52 = vsel %vm271_vm0, %v297_v45, %v298_v42  ;;  %v310_v59 = vrot.slane %v3255_v55, 1  ;;  %v307_v61 = vrot.slane %v3258_v56, 1  ;;  %4969 = vst [vmem:[#allocation6_spill] sm:$0xff] %v3277_v63  ;;  %v3280_v3 = vld [vmem:[%s3115_s28 + $0xc0] sm:$0xff]  ;;  %v313_v6 = vrot.slane %v3274_v62, 1  ;;  %v196_v19 = vld [vmem:[%s3115_s28 + $0xd8] sm:$0xff] }
  0x25   : > { %v3265_v57 = vsel %vm271_vm0, %v303_v50, %v305_v51  ;;  %v3270_v60 = vsel %vm271_vm0, %v302_v53, %v303_v50  ;;  %v315_v8 = vrot.slane %v3277_v63, 1  ;;  %v312_v13 = vrot.slane %v3280_v3, 1  ;;  %v197_v16 = vld [vmem:[%s3115_s28 + $0xe0] sm:$0xff]  ;;  %v198_v18 = vld [vmem:[%s3115_s28 + $0xe8] sm:$0x3]  ;;  %v3309_v34 = vld [vmem:[%s3115_s28 + $0xf8] sm:$0xff] }
  0x26   : > { %469 = vrot.lane.b32.xlu1 %v3177_v25, %s3032_s29  ;;  %v3287_v4 = vsel %vm271_vm0, %v308_v58, %v310_v59  ;;  %v3292_v9 = vsel %vm271_vm0, %v307_v61, %v308_v58  ;;  %v318_v21 = vrot.slane %v197_v16, 1  ;;  %v320_v26 = vrot.slane %v198_v18, 1  ;;  %v3312_v35 = vld [vmem:[%s3115_s28 + $0x100] sm:$0x3]  ;;  %v3315_v37 = vld [vmem:[%s3115_s28 + $0xf0] sm:$0xff]  ;;  %v3337_v59 = vld [vmem:[%s3115_s28 + $0x108] sm:$0xff] }
  0x27   : > { %467 = vrot.lane.b32.xlu0 %v3182_v28, %s3032_s29  ;;  %v3303_v20 = vsel %vm271_vm0, %v313_v6, %v315_v8  ;;  %v3306_v27 = vsel %vm271_vm0, %v312_v13, %v313_v6  ;;  %v317_v29 = vrot.slane %v196_v19, 1  ;;  %v323_v43 = vrot.slane %v3309_v34, 1  ;;  %v3331_v53 = vld [vmem:[%s3115_s28 + $0x110] sm:$0xff]  ;;  %v3334_v58 = vld [vmem:[%s3115_s28 + $0x118] sm:$0x3]  ;;  %v3353_v18 = vld [vmem:[%s3115_s28 + $0x128] sm:$0xff] }
  0x28   : > { %4970 = vst [vmem:[#allocation7_spill] sm:$0xff] %v3303_v20  ;;  %4971 = vst [vmem:[#allocation8_spill] sm:$0xff] %v3306_v27  ;;  %v3322_v42 = vsel %vm271_vm0, %v318_v21, %v320_v26  ;;  %v325_v45 = vrot.slane %v3312_v35, 1  ;;  %v322_v51 = vrot.slane %v3315_v37, 1  ;;  %v328_v6 = vrot.slane %v3331_v53, 1 }
  0x29   : > { %4972 = vst [vmem:[#allocation9_spill] sm:$0xff] %v3322_v42  ;;  %v3327_v50 = vsel %vm271_vm0, %v317_v29, %v318_v21  ;;  %v330_v8 = vrot.slane %v3334_v58, 1  ;;  %v327_v16 = vrot.slane %v3337_v59, 1  ;;  %4976 = vst [vmem:[#allocation13_spill] sm:$0xff] %v3353_v18  ;;  %v3356_v19 = vld [vmem:[%s3115_s28 + $0x130] sm:$0x3] }
  0x2a   : > { %473 = vrot.lane.b32.xlu1 %v3199_v33, %s3032_s29  ;;  %4973 = vst [vmem:[#allocation10_spill] sm:$0xff] %v3327_v50  ;;  %v3344_v61 = vsel %vm271_vm0, %v323_v43, %v325_v45  ;;  %v3349_v13 = vsel %vm271_vm0, %v322_v51, %v323_v43  ;;  %4977 = vst [vmem:[#allocation14_spill] sm:$0xff] %v3356_v19  ;;  %v3359_v21 = vld [vmem:[%s3115_s28 + $0x120] sm:$0xff]  ;;  %v333_v29 = vrot.slane %v3353_v18, 1  ;;  %v335_v43 = vrot.slane %v3356_v19, 1 }
  0x2b   : > { %471 = vrot.lane.b32.xlu0 %v3204_v36, %s3032_s29  ;;  %4974 = vst [vmem:[#allocation11_spill] sm:$0xff] %v3344_v61  ;;  %4975 = vst [vmem:[#allocation12_spill] sm:$0xff] %v3349_v13  ;;  %v3366_v26 = vsel %vm271_vm0, %v328_v6, %v330_v8  ;;  %v3371_v45 = vsel %vm271_vm0, %v327_v16, %v328_v6  ;;  %v332_v51 = vrot.slane %v3359_v21, 1  ;;  %v212_v16 = vld [vmem:[%s3115_s28 + $0x158] sm:$0xff]  ;;  %v213_v18 = vld [vmem:[%s3115_s28 + $0x160] sm:$0x3] }
  0x2c   : > { %4978 = vst [vmem:[#allocation15_spill] sm:$0xff] %v3359_v21  ;;  %v3382_v8 = vsel %vm271_vm0, %v333_v29, %v335_v43  ;;  %v343_v43 = vrot.slane %v212_v16, 1  ;;  %v361_v16 = vrot.slane %v3133_v7, 2  ;;  %v1494_v7 = vld [vmem:[%s4942_s1 + $0x18] sm:$0xff] }
  0x2d   : > { %v3385_v19 = vsel %vm271_vm0, %v332_v51, %v333_v29  ;;  %v354_v29 = vrot.slane %v3129_v5, 2 }
  0x2e   : > { %477 = vrot.lane.b32.xlu1 %v3221_v41, %s3032_s29 }
  0x2f   : > { %475 = vrot.lane.b32.xlu0 %v3226_v44, %s3032_s29 }
  0x32   : > { %481 = vrot.lane.b32.xlu1 %v3243_v49, %s3032_s29 }
  0x33   : > { %479 = vrot.lane.b32.xlu0 %v3248_v52, %s3032_s29 }
  0x36   : > { %485 = vrot.lane.b32.xlu1 %v3265_v57, %s3032_s29 }
  0x37   : > { %483 = vrot.lane.b32.xlu0 %v3270_v60, %s3032_s29 }
  0x3a   : > { %489 = vrot.lane.b32.xlu1 %v3287_v4, %s3032_s29 }
  0x3b   : > { %487 = vrot.lane.b32.xlu0 %v3292_v9, %s3032_s29 }
  0x3e   : > { %493 = vrot.lane.b32.xlu1 %v3303_v20, %s3032_s29  ;;  %v211_v20 = vld [vmem:[%s3115_s28 + $0x150] sm:$0xff] }
  0x3f   : > { %491 = vrot.lane.b32.xlu0 %v3306_v27, %s3032_s29  ;;  %v345_v27 = vrot.slane %v213_v18, 1  ;;  %v359_v18 = vrot.slane %v3121_v1, 2 }
  0x42   : > { %497 = vrot.lane.b32.xlu1 %v3322_v42, %s3032_s29  ;;  %v209_v42 = vld [vmem:[%s3115_s28 + $0x140] sm:$0xff] }
  0x43   : > { %495 = vrot.lane.b32.xlu0 %v3327_v50, %s3032_s29  ;;  %v208_v50 = vld [vmem:[%s3115_s28 + $0x138] sm:$0xff] }
  0x44   : > { %v337_v6 = vrot.slane %v208_v50, 1  ;;  %v3405_v50 = vsel %vm271_vm0, %v343_v43, %v345_v27 }
  0x45   : > { %4979 = vst [vmem:[#allocation16_spill] sm:$0xff] %v3405_v50 }
  0x46   : > { %501 = vrot.lane.b32.xlu1 %v3344_v61, %s3032_s29  ;;  %v210_v61 = vld [vmem:[%s3115_s28 + $0x148] sm:$0x3] }
  0x47   : > { %499 = vrot.lane.b32.xlu0 %v3349_v13, %s3032_s29  ;;  %v338_v13 = vrot.slane %v209_v42, 1  ;;  %v340_v63 = vrot.slane %v210_v61, 1  ;;  %v342_v61 = vrot.slane %v211_v20, 1 }
  0x49   : > { %v3395_v21 = vsel %vm271_vm0, %v338_v13, %v340_v63  ;;  %v3398_v42 = vsel %vm271_vm0, %v337_v6, %v338_v13  ;;  %v356_v63 = vrot.slane %v3138_v10, 2  ;;  %v3410_v51 = vsel %vm271_vm0, %v342_v61, %v343_v43  ;;  %v1492_v61 = vld [vmem:[%s4942_s1 + $0x8] sm:$0xff] }
  0x4a   : > { %505 = vrot.lane.b32.xlu1 %v3366_v26, %s3032_s29  ;;  %4980 = vst [vmem:[#allocation17_spill] sm:$0xff] %v3410_v51  ;;  %v353_v13 = vrot.slane %v3124_v2, 2  ;;  %v358_v10 = vrot.slane %v3118_v0, 2  ;;  %v362_v43 = vsel %vm352_vm1, %v359_v18, %v361_v16 }
  0x4b   : > { %503 = vrot.lane.b32.xlu0 %v3371_v45, %s3032_s29  ;;  %v357_v20 = vsel %vm352_vm1, %v354_v29, %v356_v63  ;;  %v364_v63 = vrot.slane %v3141_v11, 2 }
  0x4c   : > { %v355_v27 = vsel %vm352_vm1, %v353_v13, %v354_v29  ;;  %v360_v6 = vsel %vm352_vm1, %v358_v10, %v359_v18  ;;  %v363_v29 = vrot.slane %v3151_v15, 2  ;;  %v1491_v13 = vld [vmem:[%s4942_s1] sm:$0xff] }
  0x4e   : > { %509 = vrot.lane.b32.xlu1 %v3382_v8, %s3032_s29 }
  0x4f   : > { %507 = vrot.lane.b32.xlu0 %v3385_v19, %s3032_s29 }
  0x52   : > { %513 = vrot.lane.b32.xlu1 %v3395_v21, %s3032_s29 }
  0x53   : > { %511 = vrot.lane.b32.xlu0 %v3398_v42, %s3032_s29 }
  0x56   : > { %517 = vrot.lane.b32.xlu1 %v3405_v50, %s3032_s29 }
  0x57   : > { %515 = vrot.lane.b32.xlu0 %v3410_v51, %s3032_s29 }
  0x5a   : > { %557 = vrot.lane.b32.xlu1 %v357_v20, %s3033_s30  ;;  %v365_v20 = vsel %vm352_vm1, %v363_v29, %v364_v63 }
  0x5b   : > { %555 = vrot.lane.b32.xlu0 %v355_v27, %s3033_s30  ;;  %v366_v27 = vrot.slane %v3148_v14, 2  ;;  %v368_v14 = vrot.slane %v3171_v24, 2 }
  0x5e   : > { %653 = vrot.lane.b32.xlu1 %v3121_v1, %s3034_s4 }
  0x5f   : > { %651 = vrot.lane.b32.xlu0 %v3118_v0, %s3034_s4 }
  0x62   : > { %749 = vrot.lane.b32.xlu1 %v3158_v17, %s3035_s5  ;;  %v1493_v17 = vld [vmem:[%s4942_s1 + $0x10] sm:$0xff] }
  0x63   : > { %747 = vrot.lane.b32.xlu0 %v3144_v12, %s3035_s5  ;;  %v1495_v12 = vld [vmem:[%s4942_s1 + $0x20] sm:$0xf] }
  0x64   : > { %2804 = vmatprep.subr.msk.mxu0 %vm1593_vm2, %v1495_v12  ;;  %2884 = vmatprep.subr.msk.mxu1 %vm1593_vm2, %v1495_v12 }
  0x65   : > { %2805 = vmatpush3.msk.msra.mxu0 %vm1593_vm2, %v1495_v12  ;;  %2889 = vmatpush3.msk.msra.mxu1 %vm1593_vm2, %v1495_v12  ;;  %v371_v12 = vrot.slane %v3168_v23, 2 }
  0x66   : > { %559 = vrot.lane.b32.xlu1 %v360_v6, %s3033_s30  ;;  %2806 = vmatprep.subr.mxu0 %v1494_v7 }
  0x67   : > { %843 = vrot.lane.b32.xlu0 %v360_v6, %s3036_s6  ;;  %2807 = vmatpush3.msra.mxu0 %v1494_v7 }
  0x68   : > { %2885 = vmatprep.subr.mxu1 %v1494_v7  ;;  %2808 = vmatprep.subr.mxu0 %v1493_v17 }
  0x69   : > { %2890 = vmatpush3.msra.mxu1 %v1494_v7  ;;  %2809 = vmatpush3.msra.mxu0 %v1493_v17 }
  0x6a   : > { %939 = vrot.lane.b32.xlu1 %v3151_v15, %s3037_s7  ;;  %2810 = vmatprep.subr.mxu0 %v1492_v61 }
  0x6b   : > { %845 = vrot.lane.b32.xlu0 %v362_v43, %s3036_s6  ;;  %2811 = vmatpush3.msra.mxu0 %v1492_v61 }
  0x6c   : > { %2886 = vmatprep.subr.mxu1 %v1493_v17  ;;  %2812 = vmatprep.subr.mxu0 %v1491_v13 }
  0x6d   : > { %2891 = vmatpush3.msra.mxu1 %v1493_v17  ;;  %2813 = vmatpush3.msra.mxu0 %v1491_v13 }
  0x6e   : > { %655 = vrot.lane.b32.xlu1 %v3151_v15, %s3034_s4  ;;  %2887 = vmatprep.subr.mxu1 %v1492_v61 }
  0x6f   : > { %561 = vrot.lane.b32.xlu0 %v362_v43, %s3033_s30  ;;  %2892 = vmatpush3.msra.mxu1 %v1492_v61 }
  0x70   : > { %2888 = vmatprep.subr.mxu1 %v1491_v13 }
  0x71   : > { %2893 = vmatpush3.msra.mxu1 %v1491_v13 }
  0x72   : > { %1035 = vrot.lane.b32.xlu1 %v3182_v28, %s3038_s20 }
  0x73   : > { %941 = vrot.lane.b32.xlu0 %v3141_v11, %s3037_s7 }
  0x76   : > { %751 = vrot.lane.b32.xlu1 %v3182_v28, %s3035_s5  ;;  %v367_v28 = vsel %vm352_vm1, %v364_v63, %v366_v27  ;;  %v374_v27 = vrot.slane %v3186_v30, 2 }
  0x77   : > { %657 = vrot.lane.b32.xlu0 %v3141_v11, %s3034_s4 }
  0x7a   : > { %1131 = vrot.lane.b32.xlu1 %v365_v20, %s3039_s8 }
  0x7b   : > { %1037 = vrot.lane.b32.xlu0 %v3177_v25, %s3038_s20 }
  0x7e   : > { %847 = vrot.lane.b32.xlu1 %v365_v20, %s3036_s6 }
  0x7f   : > { %753 = vrot.lane.b32.xlu0 %v3177_v25, %s3035_s5  ;;  %v369_v25 = vrot.slane %v3165_v22, 2 }
  0x81   : > { %v370_v6 = vsel %vm352_vm1, %v368_v14, %v369_v25 }
  0x82   : > { %563 = vrot.lane.b32.xlu1 %v365_v20, %s3033_s30  ;;  %v373_v20 = vrot.slane %v3192_v32, 2 }
  0x83   : > { %1133 = vrot.lane.b32.xlu0 %v367_v28, %s3039_s8 }
  0x86   : > { %943 = vrot.lane.b32.xlu1 %v3171_v24, %s3037_s7 }
  0x87   : > { %849 = vrot.lane.b32.xlu0 %v367_v28, %s3036_s6 }
  0x8a   : > { %659 = vrot.lane.b32.xlu1 %v3171_v24, %s3034_s4 }
  0x8b   : > { %565 = vrot.lane.b32.xlu0 %v367_v28, %s3033_s30 }
  0x8e   : > { %1039 = vrot.lane.b32.xlu1 %v3204_v36, %s3038_s20 }
  0x8f   : > { %945 = vrot.lane.b32.xlu0 %v3165_v22, %s3037_s7 }
  0x90   : > { %v3494_v10 = vpop.permute.xlu1 %463 }
  0x91   : > { %v3496_v18 = vpop.permute.xlu0 %459 }
  0x92   : > { %755 = vrot.lane.b32.xlu1 %v3204_v36, %s3035_s5  ;;  %v372_v36 = vsel %vm352_vm1, %v369_v25, %v371_v12  ;;  %v375_v25 = vsel %vm352_vm1, %v373_v20, %v374_v27 }
  0x93   : > { %661 = vrot.lane.b32.xlu0 %v3165_v22, %s3034_s4 }
  0x94   : > { %v3503_v16 = vpop.permute.xlu1 %465 }
  0x95   : > { %v3505_v43 = vpop.permute.xlu0 %461 }
  0x96   : > { %1135 = vrot.lane.b32.xlu1 %v370_v6, %s3039_s8 }
  0x97   : > { %1041 = vrot.lane.b32.xlu0 %v3199_v33, %s3038_s20 }
  0x98   : > { %v3510_v24 = vpop.permute.xlu1 %469 }
  0x99   : > { %v3513_v7 = vpop.permute.xlu0 %467 }
  0x9a   : > { %851 = vrot.lane.b32.xlu1 %v370_v6, %s3036_s6 }
  0x9b   : > { %757 = vrot.lane.b32.xlu0 %v3199_v33, %s3035_s5 }
  0x9c   : > { %v3518_v22 = vpop.permute.xlu1 %473 }
  0x9d   : > { %v3521_v17 = vpop.permute.xlu0 %471 }
  0x9e   : > { %567 = vrot.lane.b32.xlu1 %v370_v6, %s3033_s30 }
  0x9f   : > { %1137 = vrot.lane.b32.xlu0 %v372_v36, %s3039_s8 }
  0xa0   : > { %v3525_v61 = vpop.permute.xlu1 %477 }
  0xa1   : > { %v3527_v23 = vpop.permute.xlu0 %475 }
  0xa2   : > { %947 = vrot.lane.b32.xlu1 %v3192_v32, %s3037_s7 }
  0xa3   : > { %853 = vrot.lane.b32.xlu0 %v372_v36, %s3036_s6 }
  0xa4   : > { %v3532_v33 = vpop.permute.xlu1 %481 }
  0xa5   : > { %v3534_v29 = vpop.permute.xlu0 %479 }
  0xa6   : > { %663 = vrot.lane.b32.xlu1 %v3192_v32, %s3034_s4 }
  0xa7   : > { %569 = vrot.lane.b32.xlu0 %v372_v36, %s3033_s30  ;;  %v376_v36 = vrot.slane %v3189_v31, 2 }
  0xa8   : > { %v3539_v63 = vpop.permute.xlu1 %485 }
  0xa9   : > { %4981 = vst [vmem:[#allocation18_spill] sm:$0xff] %v3539_v63  ;;  %v3541_v13 = vpop.permute.xlu0 %483 }
  0xaa   : > { %1043 = vrot.lane.b32.xlu1 %v3226_v44, %s3038_s20 }
  0xab   : > { %949 = vrot.lane.b32.xlu0 %v3186_v30, %s3037_s7 }
  0xac   : > { %v3549_v28 = vpop.permute.xlu1 %489 }
  0xad   : > { %4982 = vst [vmem:[#allocation19_spill] sm:$0xff] %v3549_v28  ;;  %v3551_v14 = vpop.permute.xlu0 %487 }
  0xae   : > { %4983 = vst [vmem:[#allocation20_spill] sm:$0xff] %v3551_v14  ;;  %759 = vrot.lane.b32.xlu1 %v3226_v44, %s3035_s5  ;;  %v377_v44 = vsel %vm352_vm1, %v374_v27, %v376_v36  ;;  %v378_v36 = vrot.slane %v3214_v40, 2 }
  0xaf   : > { %665 = vrot.lane.b32.xlu0 %v3186_v30, %s3034_s4 }
  0xb0   : > { %v3558_v6 = vpop.permute.xlu1 %493 }
  0xb1   : > { %4984 = vst [vmem:[#allocation21_spill] sm:$0xff] %v3558_v6  ;;  %v3560_v12 = vpop.permute.xlu0 %491 }
  0xb2   : > { %4985 = vst [vmem:[#allocation22_spill] sm:$0xff] %v3560_v12  ;;  %1139 = vrot.lane.b32.xlu1 %v375_v25, %s3039_s8 }
  0xb3   : > { %1045 = vrot.lane.b32.xlu0 %v3221_v41, %s3038_s20 }
  0xb4   : > { %v3565_v32 = vpop.permute.xlu1 %497 }
  0xb5   : > { %4986 = vst [vmem:[#allocation23_spill] sm:$0xff] %v3565_v32  ;;  %v3568_v28 = vpop.permute.xlu0 %495 }
  0xb6   : > { %4987 = vst [vmem:[#allocation24_spill] sm:$0xff] %v3568_v28  ;;  %855 = vrot.lane.b32.xlu1 %v375_v25, %s3036_s6 }
  0xb7   : > { %761 = vrot.lane.b32.xlu0 %v3221_v41, %s3035_s5 }
  0xb8   : > { %v3573_v30 = vpop.permute.xlu1 %501 }
  0xb9   : > { %4988 = vst [vmem:[#allocation25_spill] sm:$0xff] %v3573_v30  ;;  %v3576_v20 = vpop.permute.xlu0 %499 }
  0xba   : > { %4989 = vst [vmem:[#allocation26_spill] sm:$0xff] %v3576_v20  ;;  %571 = vrot.lane.b32.xlu1 %v375_v25, %s3033_s30 }
  0xbb   : > { %1141 = vrot.lane.b32.xlu0 %v377_v44, %s3039_s8 }
  0xbc   : > { %v3580_v32 = vpop.permute.xlu1 %505 }
  0xbd   : > { %4990 = vst [vmem:[#allocation27_spill] sm:$0xff] %v3580_v32  ;;  %v3582_v31 = vpop.permute.xlu0 %503 }
  0xbe   : > { %4991 = vst [vmem:[#allocation28_spill] sm:$0xff] %v3582_v31  ;;  %951 = vrot.lane.b32.xlu1 %v3214_v40, %s3037_s7 }
  0xbf   : > { %857 = vrot.lane.b32.xlu0 %v377_v44, %s3036_s6 }
  0xc0   : > { %v3587_v41 = vpop.permute.xlu1 %509 }
  0xc1   : > { %4992 = vst [vmem:[#allocation29_spill] sm:$0xff] %v3587_v41  ;;  %v3589_v28 = vpop.permute.xlu0 %507  ;;  %v379_v41 = vrot.slane %v3208_v38, 2 }
  0xc2   : > { %4993 = vst [vmem:[#allocation30_spill] sm:$0xff] %v3589_v28  ;;  %667 = vrot.lane.b32.xlu1 %v3214_v40, %s3034_s4 }
  0xc3   : > { %573 = vrot.lane.b32.xlu0 %v377_v44, %s3033_s30  ;;  %v380_v44 = vsel %vm352_vm1, %v378_v36, %v379_v41 }
  0xc4   : > { %v3594_v27 = vpop.permute.xlu1 %513 }
  0xc5   : > { %4994 = vst [vmem:[#allocation31_spill] sm:$0xff] %v3594_v27  ;;  %v3596_v25 = vpop.permute.xlu0 %511 }
  0xc6   : > { %4995 = vst [vmem:[#allocation32_spill] sm:$0xff] %v3596_v25  ;;  %1047 = vrot.lane.b32.xlu1 %v3248_v52, %s3038_s20 }
  0xc7   : > { %953 = vrot.lane.b32.xlu0 %v3208_v38, %s3037_s7 }
  0xc8   : > { %v3604_v28 = vpop.permute.xlu1 %517 }
  0xc9   : > { %4996 = vst [vmem:[#allocation33_spill] sm:$0xff] %v3604_v28  ;;  %v3606_v6 = vpop.permute.xlu0 %515  ;;  %v381_v28 = vrot.slane %v3211_v39, 2 }
  0xca   : > { %4997 = vst [vmem:[#allocation34_spill] sm:$0xff] %v3606_v6  ;;  %763 = vrot.lane.b32.xlu1 %v3248_v52, %s3035_s5 }
  0xcb   : > { %669 = vrot.lane.b32.xlu0 %v3208_v38, %s3034_s4  ;;  %v382_v38 = vsel %vm352_vm1, %v379_v41, %v381_v28  ;;  %v383_v41 = vrot.slane %v3236_v48, 2 }
  0xcc   : > { %v558_v27 = vpop.permute.xlu1 %557 }
  0xcd   : > { %v556_v25 = vpop.permute.xlu0 %555 }
  0xce   : > { %1143 = vrot.lane.b32.xlu1 %v380_v44, %s3039_s8 }
  0xcf   : > { %1049 = vrot.lane.b32.xlu0 %v3243_v49, %s3038_s20 }
  0xd0   : > { %v654_v40 = vpop.permute.xlu1 %653 }
  0xd1   : > { %v652_v12 = vpop.permute.xlu0 %651 }
  0xd2   : > { %859 = vrot.lane.b32.xlu1 %v380_v44, %s3036_s6 }
  0xd3   : > { %765 = vrot.lane.b32.xlu0 %v3243_v49, %s3035_s5 }
  0xd4   : > { %v750_v52 = vpop.permute.xlu1 %749 }
  0xd5   : > { %v748_v36 = vpop.permute.xlu0 %747 }
  0xd6   : > { %575 = vrot.lane.b32.xlu1 %v380_v44, %s3033_s30  ;;  %v384_v44 = vrot.slane %v3230_v46, 2 }
  0xd7   : > { %1145 = vrot.lane.b32.xlu0 %v382_v38, %s3039_s8 }
  0xd8   : > { %v3623_v6 = vpop.permute.xlu1 %559 }
  0xd9   : > { %v844_v32 = vpop.permute.xlu0 %843 }
  0xda   : > { %955 = vrot.lane.b32.xlu1 %v3236_v48, %s3037_s7 }
  0xdb   : > { %861 = vrot.lane.b32.xlu0 %v382_v38, %s3036_s6 }
  0xdc   : > { %v940_v39 = vpop.permute.xlu1 %939 }
  0xdd   : > { %v846_v31 = vpop.permute.xlu0 %845 }
  0xde   : > { %671 = vrot.lane.b32.xlu1 %v3236_v48, %s3034_s4  ;;  %v385_v48 = vsel %vm352_vm1, %v383_v41, %v384_v44 }
  0xdf   : > { %577 = vrot.lane.b32.xlu0 %v382_v38, %s3033_s30  ;;  %v1228_v38 = vsel %vm1227_vm3, %v3124_v2, %v3496_v18 }
  0xe0   : > { %v3631_v49 = vpop.permute.xlu1 %655  ;;  %v1261_v50 = vsel %vm1260_vm4, %v1228_v38, %v556_v25 }
  0xe1   : > { %v3633_v28 = vpop.permute.xlu0 %561  ;;  %v1294_v20 = vsel %vm1293_vm5, %v1261_v50, %v652_v12  ;;  %v386_v12 = vrot.slane %v3233_v47, 2 }
  0xe2   : > { %1051 = vrot.lane.b32.xlu1 %v3270_v60, %s3038_s20  ;;  %v1327_v51 = vsel %vm1326_vm6, %v1294_v20, %v748_v36 }
  0xe3   : > { %957 = vrot.lane.b32.xlu0 %v3230_v46, %s3037_s7  ;;  %v1360_v18 = vsel %vm1359_vm7, %v1327_v51, %v844_v32  ;;  %v1229_v51 = vsel %vm1227_vm3, %v3129_v5, %v3505_v43  ;;  %v387_v36 = vsel %vm352_vm1, %v384_v44, %v386_v12  ;;  %v403_v5 = vrot.slane %v3315_v37, 2 }
  0xe4   : > { %v1036_v14 = vpop.permute.xlu1 %1035  ;;  %v1262_v32 = vsel %vm1260_vm4, %v1229_v51, %v558_v27  ;;  %v1230_v12 = vsel %vm1227_vm3, %v3118_v0, %v3494_v10 }
  0xe5   : > { %v942_v30 = vpop.permute.xlu0 %941  ;;  %v1295_v47 = vsel %vm1293_vm5, %v1262_v32, %v654_v40 }
  0xe6   : > { %767 = vrot.lane.b32.xlu1 %v3270_v60, %s3035_s5  ;;  %v1393_v60 = vsel %vm1392_vm8, %v1360_v18, %v940_v39  ;;  %v1328_v41 = vsel %vm1326_vm6, %v1295_v47, %v750_v52  ;;  %v389_v47 = vrot.slane %v3252_v54, 2 }
  0xe7   : > { %673 = vrot.lane.b32.xlu0 %v3230_v46, %s3034_s4  ;;  %v1426_v46 = vsel %vm1425_vm9, %v1393_v60, %v1036_v14  ;;  %v1361_v38 = vsel %vm1359_vm7, %v1328_v41, %v846_v31 }
  0xe8   : > { %v752_v63 = vpop.permute.xlu1 %751  ;;  %v1394_v43 = vsel %vm1392_vm8, %v1361_v38, %v942_v30  ;;  %v406_v30 = vrot.slane %v3312_v35, 2  ;;  %v1263_v35 = vsel %vm1260_vm4, %v1230_v12, %v3623_v6 }
  0xe9   : > { %v3652_v2 = vpop.permute.xlu0 %657 }
  0xea   : > { %1147 = vrot.lane.b32.xlu1 %v385_v48, %s3039_s8 }
  0xeb   : > { %1053 = vrot.lane.b32.xlu0 %v3265_v57, %s3038_s20 }
  0xec   : > { %v1132_v50 = vpop.permute.xlu1 %1131 }
  0xed   : > { %v1038_v20 = vpop.permute.xlu0 %1037  ;;  %v1459_v25 = vsel %vm1458_vm10, %v1426_v46, %v1132_v50 }
  0xee   : > { %863 = vrot.lane.b32.xlu1 %v385_v48, %s3036_s6  ;;  %2814 = vmatprep.mubr.msk.f32.mxu0 %vm1496_vm11, %v1459_v25  ;;  %v1427_v44 = vsel %vm1425_vm9, %v1394_v43, %v1038_v20  ;;  %v1296_v20 = vsel %vm1293_vm5, %v1263_v35, %v3631_v49  ;;  %v388_v49 = vrot.slane %v3258_v56, 2 }
  0xef   : > { %769 = vrot.lane.b32.xlu0 %v3265_v57, %s3035_s5  ;;  %v404_v57 = vrot.slane %v3309_v34, 2  ;;  %v1329_v51 = vsel %vm1326_vm6, %v1296_v20, %v752_v63 }
  0xf0   : > { %v848_v14 = vpop.permute.xlu1 %847 }
  0xf1   : > { %v754_v39 = vpop.permute.xlu0 %753  ;;  %v3688_v37 = vsel %vm352_vm1, %v403_v5, %v404_v57  ;;  %v3703_v60 = vsel %vm352_vm1, %v404_v57, %v406_v30 }
  0xf2   : > { %579 = vrot.lane.b32.xlu1 %v385_v48, %s3033_s30 }
  0xf3   : > { %1149 = vrot.lane.b32.xlu0 %v387_v36, %s3039_s8 }
  0xf4   : > { %v3679_v27 = vpop.permute.xlu1 %563 }
  0xf5   : > { %v1134_v40 = vpop.permute.xlu0 %1133 }
  0xf6   : > { %v1460_v18 = vsel %vm1458_vm10, %v1427_v44, %v1134_v40  ;;  %959 = vrot.lane.b32.xlu1 %v3258_v56, %s3037_s7 }
  0xf7   : > { %865 = vrot.lane.b32.xlu0 %v387_v36, %s3036_s6  ;;  %2815 = vmatmul.mubr.msk.f32.vlgmr.msra.gmra.mxu0 %vm1496_vm11, %v1460_v18 }
  0xf8   : > { %v944_v34 = vpop.permute.xlu1 %943 }
  0xf9   : > { %v850_v31 = vpop.permute.xlu0 %849 }
  0xfa   : > { %595 = vrot.lane.b32.xlu1 %v3688_v37, %s3033_s30 }
  0xfb   : > { %581 = vrot.lane.b32.xlu0 %v387_v36, %s3033_s30  ;;  %v1362_v36 = vsel %vm1359_vm7, %v1329_v51, %v848_v14  ;;  %v1231_v14 = vsel %vm1227_vm3, %v3121_v1, %v3503_v16 }
  0xfc   : > { %v3694_v52 = vpop.permute.xlu1 %659  ;;  %v1395_v0 = vsel %vm1392_vm8, %v1362_v36, %v944_v34  ;;  %v408_v34 = vrot.slane %v3337_v59, 2 }
  0xfd   : > { %v3696_v48 = vpop.permute.xlu0 %565 }
  0xfe   : > { %961 = vrot.lane.b32.xlu1 %v3252_v54, %s3037_s7 }
  0xff   : > { %675 = vrot.lane.b32.xlu0 %v3258_v56, %s3034_s4  ;;  %v1264_v56 = vsel %vm1260_vm4, %v1231_v14, %v3633_v28 }
 0x100   : > { %v1040_v46 = vpop.permute.xlu1 %1039  ;;  %v1297_v5 = vsel %vm1293_vm5, %v1264_v56, %v3652_v2 }
 0x101   : > { %v946_v50 = vpop.permute.xlu0 %945  ;;  %v1428_v10 = vsel %vm1425_vm9, %v1395_v0, %v1040_v46  ;;  %v1330_v43 = vsel %vm1326_vm6, %v1297_v5, %v754_v39  ;;  %v4999_v5 = vld [vmem:[#allocation15_spill] sm:$0xff] }
 0x102   : > { %597 = vrot.lane.b32.xlu1 %v3703_v60, %s3033_s30  ;;  %v1363_v1 = vsel %vm1359_vm7, %v1330_v43, %v850_v31  ;;  %v409_v31 = vrot.slane %v3331_v53, 2 }
 0x103   : > { %1055 = vrot.lane.b32.xlu0 %v3292_v9, %s3038_s20  ;;  %v1396_v16 = vsel %vm1392_vm8, %v1363_v1, %v946_v50 }
 0x104   : > { %v756_v25 = vpop.permute.xlu1 %755 }
 0x105   : > { %v3717_v32 = vpop.permute.xlu0 %661 }
 0x106   : > { %691 = vrot.lane.b32.xlu1 %v3337_v59, %s3034_s4  ;;  %v1232_v59 = vsel %vm1227_vm3, %v3151_v15, %v3513_v7 }
 0x107   : > { %677 = vrot.lane.b32.xlu0 %v3252_v54, %s3034_s4  ;;  %v390_v54 = vsel %vm352_vm1, %v388_v49, %v389_v47 }
 0x108   : > { %v1136_v6 = vpop.permute.xlu1 %1135 }
 0x109   : > { %v1461_v63 = vsel %vm1458_vm10, %v1428_v10, %v1136_v6  ;;  %v1042_v41 = vpop.permute.xlu0 %1041 }
 0x10a   : > { %1057 = vrot.lane.b32.xlu1 %v3287_v4, %s3038_s20  ;;  %2817 = vmatprep.mubr.msk.f32.mxu0 %vm1496_vm11, %v1461_v63  ;;  %v1429_v44 = vsel %vm1425_vm9, %v1396_v16, %v1042_v41  ;;  %v393_v16 = vrot.slane %v3280_v3, 2 }
 0x10b   : > { %771 = vrot.lane.b32.xlu0 %v3292_v9, %s3035_s5  ;;  %v391_v9 = vrot.slane %v3255_v55, 2 }
 0x10c   : > { %v852_v38 = vpop.permute.xlu1 %851 }
 0x10d   : > { %v758_v57 = vpop.permute.xlu0 %757  ;;  %v392_v39 = vsel %vm352_vm1, %v389_v47, %v391_v9 }
 0x10e   : > { %693 = vrot.lane.b32.xlu1 %v3331_v53, %s3034_s4  ;;  %v1265_v53 = vsel %vm1260_vm4, %v1232_v59, %v3679_v27 }
 0x10f   : > { %1151 = vrot.lane.b32.xlu0 %v390_v54, %s3039_s8  ;;  %v1298_v35 = vsel %vm1293_vm5, %v1265_v53, %v3694_v52  ;;  %v411_v52 = vrot.slane %v3334_v58, 2 }
 0x110   : > { %v3749_v28 = vpop.permute.xlu1 %567  ;;  %v1331_v51 = vsel %vm1326_vm6, %v1298_v35, %v756_v25  ;;  %v1233_v25 = vsel %vm1227_vm3, %v3141_v11, %v3510_v24 }
 0x111   : > { %v1138_v40 = vpop.permute.xlu0 %1137  ;;  %v1364_v0 = vsel %vm1359_vm7, %v1331_v51, %v852_v38  ;;  %v1266_v49 = vsel %vm1260_vm4, %v1233_v25, %v3696_v48  ;;  %v3809_v58 = vsel %vm352_vm1, %v409_v31, %v411_v52 }
 0x112   : > { %v1462_v2 = vsel %vm1458_vm10, %v1429_v44, %v1138_v40  ;;  %787 = vrot.lane.b32.xlu1 %v3371_v45, %s3035_s5  ;;  %v1299_v63 = vsel %vm1293_vm5, %v1266_v49, %v3717_v32  ;;  %v394_v44 = vrot.slane %v3274_v62, 2 }
 0x113   : > { %773 = vrot.lane.b32.xlu0 %v3287_v4, %s3035_s5  ;;  %2818 = vmatmul.mubr.msk.f32.gmra.mxu0 %vm1496_vm11, %v1462_v2  ;;  %v3771_v4 = vsel %vm352_vm1, %v408_v34, %v409_v31  ;;  %v1332_v14 = vsel %vm1326_vm6, %v1299_v63, %v758_v57  ;;  %v5000_v34 = vld [vmem:[#allocation7_spill] sm:$0xff] }
 0x114   : > { %v948_v55 = vpop.permute.xlu1 %947 }
 0x115   : > { %v854_v18 = vpop.permute.xlu0 %853  ;;  %v1397_v15 = vsel %vm1392_vm8, %v1364_v0, %v948_v55  ;;  %v2943_v55 = vld [vmem:[%s3115_s28 + $0x48] sm:$0xff] }
 0x116   : > { %1153 = vrot.lane.b32.xlu1 %v392_v39, %s3039_s8  ;;  %v1365_v11 = vsel %vm1359_vm7, %v1332_v14, %v854_v18  ;;  %v1234_v18 = vsel %vm1227_vm3, %v2943_v55, %v3521_v17  ;;  %v413_v14 = vrot.slane %v4999_v5, 2 }
 0x117   : > { %867 = vrot.lane.b32.xlu0 %v390_v54, %s3036_s6  ;;  %v1267_v31 = vsel %vm1260_vm4, %v1234_v18, %v3749_v28 }
 0x118   : > { %v3763_v30 = vpop.permute.xlu1 %663 }
 0x119   : > { %v3765_v46 = vpop.permute.xlu0 %569  ;;  %v1300_v59 = vsel %vm1293_vm5, %v1267_v31, %v3763_v30 }
 0x11a   : > { %789 = vrot.lane.b32.xlu1 %v3366_v26, %s3035_s5 }
 0x11b   : > { %583 = vrot.lane.b32.xlu0 %v390_v54, %s3033_s30  ;;  %v4998_v54 = vld [vmem:[#allocation8_spill] sm:$0xff] }
 0x11c   : > { %v1044_v50 = vpop.permute.xlu1 %1043 }
 0x11d   : > { %v950_v12 = vpop.permute.xlu0 %949  ;;  %v1430_v7 = vsel %vm1425_vm9, %v1397_v15, %v1044_v50  ;;  %v5001_v50 = vld [vmem:[#allocation13_spill] sm:$0xff]  ;;  %v2944_v15 = vld [vmem:[%s3115_s28 + $0x50] sm:$0xff] }
 0x11e   : > { %883 = vrot.lane.b32.xlu1 %v3771_v4, %s3036_s6  ;;  %v1398_v24 = vsel %vm1392_vm8, %v1365_v11, %v950_v12  ;;  %v395_v12 = vsel %vm352_vm1, %v393_v16, %v394_v44 }
 0x11f   : > { %869 = vrot.lane.b32.xlu0 %v392_v39, %s3036_s6 }
 0x120   : > { %v3783_v20 = vpop.permute.xlu1 %759 }
 0x121   : > { %v3786_v36 = vpop.permute.xlu0 %665  ;;  %v1333_v53 = vsel %vm1326_vm6, %v1300_v59, %v3783_v20 }
 0x122   : > { %585 = vrot.lane.b32.xlu1 %v392_v39, %s3033_s30  ;;  %v3040_v39 = vmov 0.0  }
 0x123   : > { %963 = vrot.lane.b32.xlu0 %v3280_v3, %s3037_s7  ;;  %1859 = vst.msk [vmem:[#allocation2 + $0x20] sm:$0xff] %vm1227_vm3, %v3040_v39  ;;  %1854 = vst.msk [vmem:[#allocation2] sm:$0xff] %vm1227_vm3, %v3040_v39 }
 0x124   : > { %v1140_v27 = vpop.permute.xlu1 %1139  ;;  %1860 = vst.msk [vmem:[#allocation2 + $0x28] sm:$0x3] %vm1856_vm12, %v3040_v39  ;;  %1857 = vst.msk [vmem:[#allocation2 + $0x10] sm:$0x3] %vm1856_vm12, %v3040_v39 }
 0x125   : > { %v1463_v10 = vsel %vm1458_vm10, %v1430_v7, %v1140_v27  ;;  %v1046_v6 = vpop.permute.xlu0 %1045  ;;  %1855 = vst.msk [vmem:[#allocation2 + $0x8] sm:$0xff] %vm1227_vm3, %v3040_v39  ;;  %1858 = vst.msk [vmem:[#allocation2 + $0x18] sm:$0xff] %vm1227_vm3, %v3040_v39  ;;  %v1235_v7 = vsel %vm1227_vm3, %v2944_v15, %v3518_v22  ;;  %v5002_v27 = vld [vmem:[#allocation6_spill] sm:$0xff] }
 0x126   : > { %679 = vrot.lane.b32.xlu1 %v3280_v3, %s3034_s4  ;;  %2820 = vmatprep.mubr.msk.f32.mxu0 %vm1496_vm11, %v1463_v10  ;;  %v1431_v56 = vsel %vm1425_vm9, %v1398_v24, %v1046_v6  ;;  %1861 = vst.msk [vmem:[#allocation2 + $0x30] sm:$0xff] %vm1227_vm3, %v3040_v39  ;;  %1862 = vst.msk [vmem:[#allocation2 + $0x38] sm:$0xff] %vm1227_vm3, %v3040_v39  ;;  %v396_v52 = vrot.slane %v5002_v27, 2  ;;  %v1268_v10 = vsel %vm1260_vm4, %v1235_v7, %v3765_v46 }
 0x127   : > { %599 = vrot.lane.b32.xlu0 %v3771_v4, %s3033_s30  ;;  %1863 = vst.msk [vmem:[#allocation2 + $0x40] sm:$0x3] %vm1856_vm12, %v3040_v39  ;;  %1866 = vst.msk [vmem:[#allocation2 + $0x58] sm:$0x3] %vm1856_vm12, %v3040_v39  ;;  %v1301_v25 = vsel %vm1293_vm5, %v1268_v10, %v3786_v36  ;;  %v4034_v10 = vld [vmem:[%s3115_s28 + $0x138] sm:$0xff] }
 0x128   : > { %v3806_v47 = vpop.permute.xlu1 %855  ;;  %1864 = vst.msk [vmem:[#allocation2 + $0x48] sm:$0xff] %vm1227_vm3, %v3040_v39  ;;  %1865 = vst.msk [vmem:[#allocation2 + $0x50] sm:$0xff] %vm1227_vm3, %v3040_v39  ;;  %v397_v46 = vsel %vm352_vm1, %v394_v44, %v396_v52  ;;  %v2945_v44 = vld [vmem:[%s3115_s28 + $0x60] sm:$0xff] }
 0x129   : > { %v3813_v41 = vpop.permute.xlu0 %761  ;;  %1867 = vst.msk [vmem:[#allocation2 + $0x60] sm:$0xff] %vm1227_vm3, %v3040_v39  ;;  %1868 = vst.msk [vmem:[#allocation2 + $0x68] sm:$0xff] %vm1227_vm3, %v3040_v39  ;;  %v1366_v28 = vsel %vm1359_vm7, %v1333_v53, %v3806_v47  ;;  %v5004_v52 = vld [vmem:[#allocation10_spill] sm:$0xff] }
 0x12a   : > { %965 = vrot.lane.b32.xlu1 %v3274_v62, %s3037_s7  ;;  %1869 = vst.msk [vmem:[#allocation2 + $0x70] sm:$0x3] %vm1856_vm12, %v3040_v39  ;;  %1872 = vst.msk [vmem:[#allocation2 + $0x88] sm:$0x3] %vm1856_vm12, %v3040_v39  ;;  %v1334_v47 = vsel %vm1326_vm6, %v1301_v25, %v3813_v41  ;;  %v414_v41 = vrot.slane %v5001_v50, 2 }
 0x12b   : > { %885 = vrot.lane.b32.xlu0 %v3809_v58, %s3036_s6  ;;  %1870 = vst.msk [vmem:[#allocation2 + $0x78] sm:$0xff] %vm1227_vm3, %v3040_v39  ;;  %1871 = vst.msk [vmem:[#allocation2 + $0x80] sm:$0xff] %vm1227_vm3, %v3040_v39 }
 0x12c   : > { %v3822_v48 = vpop.permute.xlu1 %571  ;;  %1873 = vst.msk [vmem:[#allocation2 + $0x90] sm:$0xff] %vm1227_vm3, %v3040_v39  ;;  %1874 = vst.msk [vmem:[#allocation2 + $0x98] sm:$0xff] %vm1227_vm3, %v3040_v39 }
 0x12d   : > { %v1142_v38 = vpop.permute.xlu0 %1141  ;;  %1875 = vst.msk [vmem:[#allocation2 + $0xa0] sm:$0x3] %vm1856_vm12, %v3040_v39  ;;  %1878 = vst.msk [vmem:[#allocation2 + $0xb8] sm:$0x3] %vm1856_vm12, %v3040_v39 }
 0x12e   : > { %v1464_v32 = vsel %vm1458_vm10, %v1431_v56, %v1142_v38  ;;  %1059 = vrot.lane.b32.xlu1 %v4998_v54, %s3038_s20  ;;  %1876 = vst.msk [vmem:[#allocation2 + $0xa8] sm:$0xff] %vm1227_vm3, %v3040_v39  ;;  %1877 = vst.msk [vmem:[#allocation2 + $0xb0] sm:$0xff] %vm1227_vm3, %v3040_v39 }
 0x12f   : > { %979 = vrot.lane.b32.xlu0 %v4999_v5, %s3037_s7  ;;  %2821 = vmatmul.mubr.msk.f32.gmra.mxu0 %vm1496_vm11, %v1464_v32  ;;  %1879 = vst.msk [vmem:[#allocation2 + $0xc0] sm:$0xff] %vm1227_vm3, %v3040_v39  ;;  %1880 = vst.msk [vmem:[#allocation2 + $0xc8] sm:$0xff] %vm1227_vm3, %v3040_v39 }
 0x130   : > { %v3831_v57 = vpop.permute.xlu1 %951  ;;  %1881 = vst.msk [vmem:[#allocation2 + $0xd0] sm:$0x3] %vm1856_vm12, %v3040_v39  ;;  %1884 = vst.msk [vmem:[#allocation2 + $0xe8] sm:$0x3] %vm1856_vm12, %v3040_v39 }
 0x131   : > { %v3833_v43 = vpop.permute.xlu0 %857  ;;  %1882 = vst.msk [vmem:[#allocation2 + $0xd8] sm:$0xff] %vm1227_vm3, %v3040_v39  ;;  %1883 = vst.msk [vmem:[#allocation2 + $0xe0] sm:$0xff] %vm1227_vm3, %v3040_v39  ;;  %v1399_v3 = vsel %vm1392_vm8, %v1366_v28, %v3831_v57  ;;  %v5003_v57 = vld [vmem:[#allocation14_spill] sm:$0xff] }
 0x132   : > { %681 = vrot.lane.b32.xlu1 %v3274_v62, %s3034_s4  ;;  %1885 = vst.msk [vmem:[#allocation2 + $0xf0] sm:$0xff] %vm1227_vm3, %v3040_v39  ;;  %1886 = vst.msk [vmem:[#allocation2 + $0xf8] sm:$0xff] %vm1227_vm3, %v3040_v39  ;;  %v1367_v22 = vsel %vm1359_vm7, %v1334_v47, %v3833_v43  ;;  %v416_v43 = vrot.slane %v5003_v57, 2 }
 0x133   : > { %601 = vrot.lane.b32.xlu0 %v3809_v58, %s3033_s30  ;;  %1887 = vst.msk [vmem:[#allocation2 + $0x100] sm:$0x3] %vm1856_vm12, %v3040_v39  ;;  %1890 = vst.msk [vmem:[#allocation2 + $0x118] sm:$0x3] %vm1856_vm12, %v3040_v39 }
 0x134   : > { %v3839_v1 = vpop.permute.xlu1 %667  ;;  %1888 = vst.msk [vmem:[#allocation2 + $0x108] sm:$0xff] %vm1227_vm3, %v3040_v39  ;;  %1889 = vst.msk [vmem:[#allocation2 + $0x110] sm:$0xff] %vm1227_vm3, %v3040_v39  ;;  %v417_v18 = vsel %vm352_vm1, %v414_v41, %v416_v43  ;;  %v2952_v43 = vld [vmem:[%s3115_s28 + $0xe8] sm:$0x3] }
 0x135   : > { %v3841_v9 = vpop.permute.xlu0 %573  ;;  %1891 = vst.msk [vmem:[#allocation2 + $0x120] sm:$0xff] %vm1227_vm3, %v3040_v39  ;;  %1892 = vst.msk [vmem:[#allocation2 + $0x128] sm:$0xff] %vm1227_vm3, %v3040_v39 }
 0x136   : > { %775 = vrot.lane.b32.xlu1 %v4998_v54, %s3035_s5  ;;  %1893 = vst.msk [vmem:[#allocation2 + $0x130] sm:$0x3] %vm1856_vm12, %v3040_v39  ;;  %1896 = vst.msk [vmem:[#allocation2 + $0x148] sm:$0x3] %vm1856_vm12, %v3040_v39 }
 0x137   : > { %695 = vrot.lane.b32.xlu0 %v4999_v5, %s3034_s4  ;;  %1894 = vst.msk [vmem:[#allocation2 + $0x138] sm:$0xff] %vm1227_vm3, %v3040_v39  ;;  %1895 = vst.msk [vmem:[#allocation2 + $0x140] sm:$0xff] %vm1227_vm3, %v3040_v39 }
 0x138   : > { %v3849_v40 = vpop.permute.xlu1 %1047  ;;  %1897 = vst.msk [vmem:[#allocation2 + $0x150] sm:$0xff] %vm1227_vm3, %v3040_v39  ;;  %1898 = vst.msk [vmem:[#allocation2 + $0x158] sm:$0xff] %vm1227_vm3, %v3040_v39 }
 0x139   : > { %v3851_v2 = vpop.permute.xlu0 %953  ;;  %1899 = vst.msk [vmem:[#allocation2 + $0x160] sm:$0x3] %vm1856_vm12, %v3040_v39  ;;  %1902 = vst.msk [vmem:[#allocation2 + $0x178] sm:$0x3] %vm1856_vm12, %v3040_v39  ;;  %v1432_v30 = vsel %vm1425_vm9, %v1399_v3, %v3849_v40  ;;  %v1236_v40 = vsel %vm1227_vm3, %v2945_v44, %v3527_v23 }
 0x13a   : > { %1900 = vst.msk [vmem:[#allocation2 + $0x168] sm:$0xff] %vm1227_vm3, %v3040_v39  ;;  %1901 = vst.msk [vmem:[#allocation2 + $0x170] sm:$0xff] %vm1227_vm3, %v3040_v39  ;;  %1061 = vrot.lane.b32.xlu1 %v5000_v34, %s3038_s20  ;;  %v1400_v63 = vsel %vm1392_vm8, %v1367_v22, %v3851_v2  ;;  %v3984_v2 = vld [vmem:[%s3115_s28 + $0xd8] sm:$0xff] }
 0x13b   : > { %1903 = vst.msk [vmem:[#allocation2 + $0x180] sm:$0xff] %vm1227_vm3, %v3040_v39  ;;  %1904 = vst.msk [vmem:[#allocation2 + $0x188] sm:$0xff] %vm1227_vm3, %v3040_v39  ;;  %981 = vrot.lane.b32.xlu0 %v5001_v50, %s3037_s7  ;;  %v398_v22 = vrot.slane %v3984_v2, 2 }
 0x13c   : > { %1905 = vst.msk [vmem:[#allocation2 + $0x190] sm:$0x3] %vm1856_vm12, %v3040_v39  ;;  %v764_v17 = vpop.permute.xlu1 %763  ;;  %v1269_v39 = vsel %vm1260_vm4, %v1236_v40, %v3822_v48 }
 0x13d   : > { %v3922_v35 = vpop.permute.xlu0 %669 }
 0x13e   : > { %1155 = vrot.lane.b32.xlu1 %v395_v12, %s3039_s8 }
 0x13f   : > { %1075 = vrot.lane.b32.xlu0 %v3385_v19, %s3038_s20 }
 0x140   : > { %v1144_v51 = vpop.permute.xlu1 %1143 }
 0x141   : > { %v1465_v0 = vsel %vm1458_vm10, %v1432_v30, %v1144_v51  ;;  %v1050_v20 = vpop.permute.xlu0 %1049 }
 0x142   : > { %777 = vrot.lane.b32.xlu1 %v5000_v34, %s3035_s5  ;;  %2823 = vmatprep.mubr.msk.f32.mxu0 %vm1496_vm11, %v1465_v0  ;;  %v1433_v11 = vsel %vm1425_vm9, %v1400_v63, %v1050_v20  ;;  %v4020_v20 = vld [vmem:[%s3115_s28 + $0xe0] sm:$0xff] }
 0x143   : > { %697 = vrot.lane.b32.xlu0 %v5001_v50, %s3034_s4 }
 0x144   : > { %v860_v6 = vpop.permute.xlu1 %859 }
 0x145   : > { %v766_v49 = vpop.permute.xlu0 %765 }
 0x146   : > { %871 = vrot.lane.b32.xlu1 %v395_v12, %s3036_s6 }
 0x147   : > { %791 = vrot.lane.b32.xlu0 %v3385_v19, %s3035_s5  ;;  %v415_v19 = vsel %vm352_vm1, %v413_v14, %v414_v41  ;;  %v5005_v41 = vld [vmem:[#allocation9_spill] sm:$0xff] }
 0x148   : > { %v3959_v36 = vpop.permute.xlu1 %575 }
 0x149   : > { %v1146_v24 = vpop.permute.xlu0 %1145 }
 0x14a   : > { %v1466_v56 = vsel %vm1458_vm10, %v1433_v11, %v1146_v24  ;;  %1157 = vrot.lane.b32.xlu1 %v397_v46, %s3039_s8  ;;  %v4057_v11 = vld [vmem:[%s3115_s28 + $0x140] sm:$0xff] }
 0x14b   : > { %1077 = vrot.lane.b32.xlu0 %v3382_v8, %s3038_s20  ;;  %2824 = vmatmul.mubr.msk.f32.gmra.mxu0 %vm1496_vm11, %v1466_v56 }
 0x14c   : > { %v956_v62 = vpop.permute.xlu1 %955 }
 0x14d   : > { %v862_v38 = vpop.permute.xlu0 %861 }
 0x14e   : > { %587 = vrot.lane.b32.xlu1 %v395_v12, %s3033_s30 }
 0x14f   : > { %1171 = vrot.lane.b32.xlu0 %v415_v19, %s3039_s8 }
 0x150   : > { %v3972_v32 = vpop.permute.xlu1 %671 }
 0x151   : > { %v3974_v54 = vpop.permute.xlu0 %577 }
 0x152   : > { %873 = vrot.lane.b32.xlu1 %v397_v46, %s3036_s6 }
 0x153   : > { %793 = vrot.lane.b32.xlu0 %v3382_v8, %s3035_s5  ;;  %v1302_v8 = vsel %vm1293_vm5, %v1269_v39, %v3839_v1 }
 0x154   : > { %v1052_v5 = vpop.permute.xlu1 %1051  ;;  %v1335_v23 = vsel %vm1326_vm6, %v1302_v8, %v764_v17  ;;  %v2947_v17 = vld [vmem:[%s3115_s28 + $0x68] sm:$0xff] }
 0x155   : > { %v958_v16 = vpop.permute.xlu0 %957  ;;  %v1368_v31 = vsel %vm1359_vm7, %v1335_v23, %v860_v6  ;;  %v1237_v53 = vsel %vm1227_vm3, %v2947_v17, %v3525_v61 }
 0x156   : > { %967 = vrot.lane.b32.xlu1 %v3984_v2, %s3037_s7  ;;  %v1401_v48 = vsel %vm1392_vm8, %v1368_v31, %v956_v62  ;;  %v1270_v28 = vsel %vm1260_vm4, %v1237_v53, %v3841_v9 }
 0x157   : > { %887 = vrot.lane.b32.xlu0 %v415_v19, %s3036_s6  ;;  %v1434_v50 = vsel %vm1425_vm9, %v1401_v48, %v1052_v5  ;;  %v1303_v30 = vsel %vm1293_vm5, %v1270_v28, %v3922_v35  ;;  %v2951_v5 = vld [vmem:[%s3115_s28 + $0x78] sm:$0xff]  ;;  %v419_v48 = vrot.slane %v4057_v11, 2 }
 0x158   : > { %v3993_v55 = vpop.permute.xlu1 %767  ;;  %v1336_v0 = vsel %vm1326_vm6, %v1303_v30, %v766_v49  ;;  %v1238_v57 = vsel %vm1227_vm3, %v2951_v5, %v3534_v29 }
 0x159   : > { %v3997_v34 = vpop.permute.xlu0 %673  ;;  %v1369_v61 = vsel %vm1359_vm7, %v1336_v0, %v862_v38  ;;  %v1271_v44 = vsel %vm1260_vm4, %v1238_v57, %v3959_v36  ;;  %v5006_v57 = vld [vmem:[#allocation12_spill] sm:$0xff] }
 0x15a   : > { %589 = vrot.lane.b32.xlu1 %v397_v46, %s3033_s30  ;;  %v1402_v15 = vsel %vm1392_vm8, %v1369_v61, %v958_v16  ;;  %v399_v46 = vrot.slane %v4020_v20, 2  ;;  %v401_v16 = vrot.slane %v2952_v43, 2  ;;  %v1304_v39 = vsel %vm1293_vm5, %v1271_v44, %v3972_v32  ;;  %v4165_v43 = vld [vmem:[%s3115_s28 + $0x150] sm:$0xff] }
 0x15b   : > { %1173 = vrot.lane.b32.xlu0 %v417_v18, %s3039_s8  ;;  %v418_v32 = vrot.slane %v4034_v10, 2 }
 0x15c   : > { %v1148_v1 = vpop.permute.xlu1 %1147  ;;  %v400_v24 = vsel %vm352_vm1, %v398_v22, %v399_v46  ;;  %v402_v23 = vsel %vm352_vm1, %v399_v46, %v401_v16 }
 0x15d   : > { %v1467_v12 = vsel %vm1458_vm10, %v1434_v50, %v1148_v1  ;;  %v1054_v59 = vpop.permute.xlu0 %1053  ;;  %v2953_v1 = vld [vmem:[%s3115_s28 + $0x80] sm:$0xff] }
 0x15e   : > { %683 = vrot.lane.b32.xlu1 %v3984_v2, %s3034_s4  ;;  %2826 = vmatprep.mubr.msk.f32.mxu0 %vm1496_vm11, %v1467_v12  ;;  %v1435_v7 = vsel %vm1425_vm9, %v1402_v15, %v1054_v59  ;;  %v1239_v12 = vsel %vm1227_vm3, %v2953_v1, %v3532_v33  ;;  %v420_v33 = vsel %vm352_vm1, %v418_v32, %v419_v48  ;;  %v5007_v32 = vld [vmem:[#allocation11_spill] sm:$0xff] }
 0x15f   : > { %603 = vrot.lane.b32.xlu0 %v415_v19, %s3033_s30 }
 0x160   : > { %v864_v3 = vpop.permute.xlu1 %863 }
 0x161   : > { %v4016_v51 = vpop.permute.xlu0 %769 }
 0x162   : > { %969 = vrot.lane.b32.xlu1 %v4020_v20, %s3037_s7 }
 0x163   : > { %889 = vrot.lane.b32.xlu0 %v417_v18, %s3036_s6 }
 0x164   : > { %v4027_v9 = vpop.permute.xlu1 %579 }
 0x165   : > { %v1150_v35 = vpop.permute.xlu0 %1149 }
 0x166   : > { %v1468_v27 = vsel %vm1458_vm10, %v1435_v7, %v1150_v35  ;;  %1063 = vrot.lane.b32.xlu1 %v5004_v52, %s3038_s20  ;;  %v2954_v7 = vld [vmem:[%s3115_s28 + $0x148] sm:$0x3] }
 0x167   : > { %983 = vrot.lane.b32.xlu0 %v4034_v10, %s3037_s7  ;;  %2827 = vmatmul.mubr.msk.f32.gmra.mxu0 %vm1496_vm11, %v1468_v27  ;;  %v421_v35 = vrot.slane %v2954_v7, 2 }
 0x168   : > { %v960_v6 = vpop.permute.xlu1 %959 }
 0x169   : > { %v866_v25 = vpop.permute.xlu0 %865 }
 0x16a   : > { %685 = vrot.lane.b32.xlu1 %v4020_v20, %s3034_s4 }
 0x16b   : > { %605 = vrot.lane.b32.xlu0 %v417_v18, %s3033_s30  ;;  %v1337_v18 = vsel %vm1326_vm6, %v1304_v39, %v3993_v55 }
 0x16c   : > { %v4042_v49 = vpop.permute.xlu1 %595  ;;  %v1370_v29 = vsel %vm1359_vm7, %v1337_v18, %v864_v3 }
 0x16d   : > { %v4044_v47 = vpop.permute.xlu0 %581  ;;  %v1403_v36 = vsel %vm1392_vm8, %v1370_v29, %v960_v6 }
 0x16e   : > { %779 = vrot.lane.b32.xlu1 %v5004_v52, %s3035_s5  ;;  %v4133_v52 = vld [vmem:[%s3115_s28 + $0xf0] sm:$0xff] }
 0x16f   : > { %699 = vrot.lane.b32.xlu0 %v4034_v10, %s3034_s4 }
 0x170   : > { %v962_v63 = vpop.permute.xlu1 %961 }
 0x171   : > { %v4052_v14 = vpop.permute.xlu0 %675 }
 0x172   : > { %1065 = vrot.lane.b32.xlu1 %v5005_v41, %s3038_s20 }
 0x173   : > { %985 = vrot.lane.b32.xlu0 %v4057_v11, %s3037_s7 }
 0x174   : > { %v4062_v56 = vpop.permute.xlu1 %597 }
 0x175   : > { %v1056_v62 = vpop.permute.xlu0 %1055 }
 0x176   : > { %1159 = vrot.lane.b32.xlu1 %v400_v24, %s3039_s8  ;;  %v1436_v50 = vsel %vm1425_vm9, %v1403_v36, %v1056_v62 }
 0x177   : > { %1079 = vrot.lane.b32.xlu0 %v3398_v42, %s3038_s20 }
 0x178   : > { %v4067_v19 = vpop.permute.xlu1 %691 }
 0x179   : > { %v4069_v38 = vpop.permute.xlu0 %677 }
 0x17a   : > { %781 = vrot.lane.b32.xlu1 %v5005_v41, %s3035_s5 }
 0x17b   : > { %701 = vrot.lane.b32.xlu0 %v4057_v11, %s3034_s4 }
 0x17c   : > { %v1058_v40 = vpop.permute.xlu1 %1057 }
 0x17d   : > { %v4083_v8 = vpop.permute.xlu0 %771 }
 0x17e   : > { %875 = vrot.lane.b32.xlu1 %v400_v24, %s3036_s6 }
 0x17f   : > { %795 = vrot.lane.b32.xlu0 %v3398_v42, %s3035_s5  ;;  %v1272_v42 = vsel %vm1260_vm4, %v1239_v12, %v3974_v54 }
 0x180   : > { %v4093_v31 = vpop.permute.xlu1 %693  ;;  %v1305_v17 = vsel %vm1293_vm5, %v1272_v42, %v3997_v34  ;;  %v5008_v42 = vld [vmem:[#allocation17_spill] sm:$0xff] }
 0x181   : > { %v1152_v55 = vpop.permute.xlu0 %1151  ;;  %v1338_v28 = vsel %vm1326_vm6, %v1305_v17, %v4016_v51 }
 0x182   : > { %v1469_v59 = vsel %vm1458_vm10, %v1436_v50, %v1152_v55  ;;  %1161 = vrot.lane.b32.xlu1 %v402_v23, %s3039_s8  ;;  %v1371_v54 = vsel %vm1359_vm7, %v1338_v28, %v866_v25  ;;  %v422_v25 = vsel %vm352_vm1, %v419_v48, %v421_v35  ;;  %v4194_v50 = vld [vmem:[%s3115_s28 + $0x158] sm:$0xff] }
 0x183   : > { %1081 = vrot.lane.b32.xlu0 %v3395_v21, %s3038_s20  ;;  %2829 = vmatprep.mubr.msk.f32.mxu0 %vm1496_vm11, %v1469_v59  ;;  %v1404_v30 = vsel %vm1392_vm8, %v1371_v54, %v962_v63 }
 0x184   : > { %v4110_v53 = vpop.permute.xlu1 %787  ;;  %v1437_v34 = vsel %vm1425_vm9, %v1404_v30, %v1058_v40  ;;  %v2960_v30 = vld [vmem:[%s3115_s28 + $0x98] sm:$0xff] }
 0x185   : > { %v4115_v3 = vpop.permute.xlu0 %773 }
 0x186   : > { %591 = vrot.lane.b32.xlu1 %v400_v24, %s3033_s30  ;;  %v4155_v24 = vld [vmem:[%s3115_s28 + $0xf8] sm:$0xff] }
 0x187   : > { %1175 = vrot.lane.b32.xlu0 %v420_v33, %s3039_s8 }
 0x188   : > { %v1154_v0 = vpop.permute.xlu1 %1153 }
 0x189   : > { %v1470_v61 = vsel %vm1458_vm10, %v1437_v34, %v1154_v0  ;;  %v868_v15 = vpop.permute.xlu0 %867  ;;  %v5009_v34 = vld [vmem:[#allocation18_spill] sm:$0xff] }
 0x18a   : > { %877 = vrot.lane.b32.xlu1 %v402_v23, %s3036_s6  ;;  %2830 = vmatmul.mubr.msk.f32.gmra.mxu0 %vm1496_vm11, %v1470_v61  ;;  %v1241_v0 = vsel %vm1227_vm3, %v2960_v30, %v5009_v34 }
 0x18b   : > { %797 = vrot.lane.b32.xlu0 %v3395_v21, %s3035_s5  ;;  %v1274_v61 = vsel %vm1260_vm4, %v1241_v0, %v4044_v47 }
 0x18c   : > { %v4127_v51 = vpop.permute.xlu1 %789  ;;  %v1307_v7 = vsel %vm1293_vm5, %v1274_v61, %v4069_v38  ;;  %v5010_v38 = vld [vmem:[#allocation26_spill] sm:$0xff]  ;;  %v4288_v61 = vld [vmem:[%s3115_s28 + $0x108] sm:$0xff] }
 0x18d   : > { %v4130_v27 = vpop.permute.xlu0 %583 }
 0x18e   : > { %971 = vrot.lane.b32.xlu1 %v4133_v52, %s3037_s7 }
 0x18f   : > { %891 = vrot.lane.b32.xlu0 %v420_v33, %s3036_s6 }
 0x190   : > { %v4138_v6 = vpop.permute.xlu1 %883 }
 0x191   : > { %v4141_v21 = vpop.permute.xlu0 %869 }
 0x192   : > { %593 = vrot.lane.b32.xlu1 %v402_v23, %s3033_s30  ;;  %v2958_v23 = vld [vmem:[%s3115_s28 + $0x90] sm:$0xff] }
 0x193   : > { %1177 = vrot.lane.b32.xlu0 %v422_v25, %s3039_s8  ;;  %v1240_v36 = vsel %vm1227_vm3, %v2958_v23, %v3541_v13 }
 0x194   : > { %v4145_v22 = vpop.permute.xlu1 %585  ;;  %v1273_v48 = vsel %vm1260_vm4, %v1240_v36, %v4027_v9 }
 0x195   : > { %v964_v46 = vpop.permute.xlu0 %963  ;;  %v1306_v55 = vsel %vm1293_vm5, %v1273_v48, %v4052_v14 }
 0x196   : > { %687 = vrot.lane.b32.xlu1 %v4133_v52, %s3034_s4  ;;  %v1339_v12 = vsel %vm1326_vm6, %v1306_v55, %v4083_v8 }
 0x197   : > { %607 = vrot.lane.b32.xlu0 %v420_v33, %s3033_s30  ;;  %v1372_v59 = vsel %vm1359_vm7, %v1339_v12, %v868_v15 }
 0x198   : > { %v4150_v63 = vpop.permute.xlu1 %679  ;;  %v1405_v9 = vsel %vm1392_vm8, %v1372_v59, %v964_v46  ;;  %v423_v46 = vrot.slane %v4165_v43, 2 }
 0x199   : > { %v4152_v41 = vpop.permute.xlu0 %599 }
 0x19a   : > { %973 = vrot.lane.b32.xlu1 %v4155_v24, %s3037_s7 }
 0x19b   : > { %893 = vrot.lane.b32.xlu0 %v422_v25, %s3036_s6 }
 0x19c   : > { %v966_v62 = vpop.permute.xlu1 %965 }
 0x19d   : > { %v4160_v5 = vpop.permute.xlu0 %885 }
 0x19e   : > { %1067 = vrot.lane.b32.xlu1 %v5006_v57, %s3038_s20 }
 0x19f   : > { %987 = vrot.lane.b32.xlu0 %v4165_v43, %s3037_s7 }
 0x1a0   : > { %v1060_v16 = vpop.permute.xlu1 %1059 }
 0x1a1   : > { %v4169_v44 = vpop.permute.xlu0 %979  ;;  %v1438_v17 = vsel %vm1425_vm9, %v1405_v9, %v1060_v16 }
 0x1a2   : > { %689 = vrot.lane.b32.xlu1 %v4155_v24, %s3034_s4 }
 0x1a3   : > { %609 = vrot.lane.b32.xlu0 %v422_v25, %s3033_s30 }
 0x1a4   : > { %v4174_v40 = vpop.permute.xlu1 %681 }
 0x1a5   : > { %v4176_v39 = vpop.permute.xlu0 %601 }
 0x1a6   : > { %783 = vrot.lane.b32.xlu1 %v5006_v57, %s3035_s5  ;;  %v424_v57 = vrot.slane %v4194_v50, 2 }
 0x1a7   : > { %703 = vrot.lane.b32.xlu0 %v4165_v43, %s3034_s4 }
 0x1a8   : > { %v4182_v18 = vpop.permute.xlu1 %775  ;;  %v425_v59 = vsel %vm352_vm1, %v423_v46, %v424_v57 }
 0x1a9   : > { %v4184_v29 = vpop.permute.xlu0 %695 }
 0x1aa   : > { %1069 = vrot.lane.b32.xlu1 %v5007_v32, %s3038_s20 }
 0x1ab   : > { %989 = vrot.lane.b32.xlu0 %v4194_v50, %s3037_s7 }
 0x1ac   : > { %v1062_v1 = vpop.permute.xlu1 %1061 }
 0x1ad   : > { %v4202_v13 = vpop.permute.xlu0 %981 }
 0x1ae   : > { %1163 = vrot.lane.b32.xlu1 %v3688_v37, %s3039_s8 }
 0x1af   : > { %1083 = vrot.lane.b32.xlu0 %v5008_v42, %s3038_s20 }
 0x1b0   : > { %v1156_v14 = vpop.permute.xlu1 %1155 }
 0x1b1   : > { %v1471_v33 = vsel %vm1458_vm10, %v1438_v17, %v1156_v14  ;;  %v1076_v28 = vpop.permute.xlu0 %1075 }
 0x1b2   : > { %785 = vrot.lane.b32.xlu1 %v5007_v32, %s3035_s5  ;;  %2832 = vmatprep.mubr.msk.f32.mxu0 %vm1496_vm11, %v1471_v33  ;;  %v1248_v32 = vsel %vm1227_vm3, %v4133_v52, %v5010_v38 }
 0x1b3   : > { %705 = vrot.lane.b32.xlu0 %v4194_v50, %s3034_s4  ;;  %v1281_v55 = vsel %vm1260_vm4, %v1248_v32, %v4042_v49 }
 0x1b4   : > { %v4217_v8 = vpop.permute.xlu1 %777  ;;  %v1314_v9 = vsel %vm1293_vm5, %v1281_v55, %v4067_v19 }
 0x1b5   : > { %v4219_v54 = vpop.permute.xlu0 %697 }
 0x1b6   : > { %879 = vrot.lane.b32.xlu1 %v3688_v37, %s3036_s6  ;;  %v1340_v37 = vsel %vm1326_vm6, %v1307_v7, %v4115_v3  ;;  %v5011_v3 = vld [vmem:[#allocation16_spill] sm:$0xff] }
 0x1b7   : > { %v2816_v15 = vpop.f32.mrf.mxu0  ;;  %799 = vrot.lane.b32.xlu0 %v5008_v42, %s3035_s5  ;;  %v1373_v47 = vsel %vm1359_vm7, %v1340_v37, %v4141_v21 }
 0x1b8   : > { %v1823_v35 = vmax.f32 %v2816_v15, 0.0  ;;  %v4232_v25 = vpop.permute.xlu1 %871  ;;  %v1406_v48 = vsel %vm1392_vm8, %v1373_v47, %v966_v62  ;;  %v1347_v62 = vsel %vm1326_vm6, %v1314_v9, %v4110_v53 }
 0x1b9   : > { %v1663_v16 = vpop.f32.mrf.mxu0  ;;  %v4238_v23 = vpop.permute.xlu0 %791  ;;  %v1439_v21 = vsel %vm1425_vm9, %v1406_v48, %v1062_v1  ;;  %v1380_v49 = vsel %vm1359_vm7, %v1347_v62, %v4138_v6  ;;  %v2961_v1 = vld [vmem:[%s3115_s28 + $0x160] sm:$0x3] }
 0x1ba   : > { %1911 = vst.msk [vmem:[#allocation2 + $0x21] sm:$0xff] %vm1227_vm3, %v1823_v35  ;;  %v1822_v36 = vmax.f32 %v1663_v16, 0.0  ;;  %1165 = vrot.lane.b32.xlu1 %v3703_v60, %s3039_s8  ;;  %v426_v17 = vrot.slane %v2961_v1, 2  ;;  %v1413_v19 = vsel %vm1392_vm8, %v1380_v49, %v4169_v44 }
 0x1bb   : > { %1085 = vrot.lane.b32.xlu0 %v5011_v3, %s3038_s20  ;;  %v1446_v53 = vsel %vm1425_vm9, %v1413_v19, %v1076_v28  ;;  %v5012_v28 = vld [vmem:[#allocation25_spill] sm:$0xff] }
 0x1bc   : > { %1910 = vst.msk [vmem:[#allocation2 + $0x19] sm:$0xff] %vm1227_vm3, %v1822_v36  ;;  %v1158_v12 = vpop.permute.xlu1 %1157  ;;  %v427_v6 = vsel %vm352_vm1, %v424_v57, %v426_v17  ;;  %v1249_v0 = vsel %vm1227_vm3, %v4155_v24, %v5012_v28  ;;  %v4307_v57 = vld [vmem:[%s3115_s28 + $0x168] sm:$0xff] }
 0x1bd   : > { %v1472_v52 = vsel %vm1458_vm10, %v1439_v21, %v1158_v12  ;;  %v1078_v42 = vpop.permute.xlu0 %1077  ;;  %v347_v32 = vrot.slane %v4307_v57, 1  ;;  %v428_v19 = vrot.slane %v4307_v57, 2 }
 0x1be   : > { %801 = vrot.lane.b32.xlu1 %v5011_v3, %s3035_s5  ;;  %2833 = vmatmul.mubr.msk.f32.gmra.mxu0 %vm1496_vm11, %v1472_v52  ;;  %v216_v52 = vld [vmem:[%s3115_s28 + $0x178] sm:$0x3] }
 0x1bf   : > { %1179 = vrot.lane.b32.xlu0 %v425_v59, %s3039_s8  ;;  %v350_v62 = vrot.slane %v216_v52, 1 }
 0x1c0   : > { %v4270_v14 = vpop.permute.xlu1 %587 }
 0x1c1   : > { %v1172_v33 = vpop.permute.xlu0 %1171 }
 0x1c2   : > { %895 = vrot.lane.b32.xlu1 %v425_v59, %s3036_s6  ;;  %v1479_v30 = vsel %vm1458_vm10, %v1446_v53, %v1172_v33 }
 0x1c3   : > { %881 = vrot.lane.b32.xlu0 %v3703_v60, %s3036_s6  ;;  %2844 = vmatprep.mubr.msk.f32.mxu1 %vm1496_vm11, %v1479_v30  ;;  %v1282_v60 = vsel %vm1260_vm4, %v1249_v0, %v4062_v56  ;;  %v2964_v30 = vld [vmem:[%s3115_s28 + $0xa8] sm:$0xff] }
 0x1c4   : > { %v4279_v34 = vpop.permute.xlu1 %873  ;;  %v1315_v7 = vsel %vm1293_vm5, %v1282_v60, %v4093_v31 }
 0x1c5   : > { %v4281_v44 = vpop.permute.xlu0 %793  ;;  %v1348_v24 = vsel %vm1326_vm6, %v1315_v7, %v4127_v51  ;;  %v4318_v51 = vld [vmem:[%s3115_s28 + $0x110] sm:$0xff] }
 0x1c6   : > { %1181 = vrot.lane.b32.xlu1 %v427_v6, %s3039_s8  ;;  %v1381_v46 = vsel %vm1359_vm7, %v1348_v24, %v4160_v5 }
 0x1c7   : > { %975 = vrot.lane.b32.xlu0 %v4288_v61, %s3037_s7  ;;  %v1414_v56 = vsel %vm1392_vm8, %v1381_v46, %v4202_v13  ;;  %v4326_v13 = vld [vmem:[%s3115_s28 + $0x170] sm:$0xff] }
 0x1c8   : > { %v4294_v15 = vpop.permute.xlu1 %967  ;;  %v1447_v31 = vsel %vm1425_vm9, %v1414_v56, %v1078_v42  ;;  %v348_v48 = vrot.slane %v4326_v13, 1  ;;  %v429_v53 = vrot.slane %v4326_v13, 2 }
 0x1c9   : > { %v4298_v35 = vpop.permute.xlu0 %887 }
 0x1ca   : > { %897 = vrot.lane.b32.xlu1 %v427_v6, %s3036_s6  ;;  %v351_v17 = vsel %vm271_vm0, %v348_v48, %v350_v62 }
 0x1cb   : > { %611 = vrot.lane.b32.xlu0 %v425_v59, %s3033_s30 }
 0x1cc   : > { %v4311_v37 = vpop.permute.xlu1 %589 }
 0x1cd   : > { %v1174_v16 = vpop.permute.xlu0 %1173 }
 0x1ce   : > { %v1480_v47 = vsel %vm1458_vm10, %v1447_v31, %v1174_v16  ;;  %991 = vrot.lane.b32.xlu1 %v4307_v57, %s3037_s7  ;;  %v431_v31 = vrot.slane %v216_v52, 2 }
 0x1cf   : > { %977 = vrot.lane.b32.xlu0 %v4318_v51, %s3037_s7  ;;  %2845 = vmatmul.mubr.msk.f32.vlgmr.msra.gmra.mxu1 %vm1496_vm11, %v1480_v47 }
 0x1d0   : > { %v4323_v5 = vpop.permute.xlu1 %683 }
 0x1d1   : > { %v4328_v36 = vpop.permute.xlu0 %603 }
 0x1d2   : > { %613 = vrot.lane.b32.xlu1 %v427_v6, %s3033_s30  ;;  %v5013_v6 = vld [vmem:[#allocation20_spill] sm:$0xff] }
 0x1d3   : > { %v2819_v38 = vpop.f32.mrf.mxu0  ;;  %1071 = vrot.lane.b32.xlu0 %v3371_v45, %s3038_s20  ;;  %v349_v45 = vsel %vm271_vm0, %v347_v32, %v348_v48  ;;  %v1242_v28 = vsel %vm1227_vm3, %v2964_v30, %v5013_v6  ;;  %v5014_v32 = vld [vmem:[#allocation19_spill] sm:$0xff]  ;;  %v5015_v30 = vld [vmem:[#allocation28_spill] sm:$0xff] }
 0x1d4   : > { %v1825_v3 = vmax.f32 %v2819_v38, 0.0  ;;  %v4335_v55 = vpop.permute.xlu1 %969  ;;  %v1275_v0 = vsel %vm1260_vm4, %v1242_v28, %v4130_v27 }
 0x1d5   : > { %v1673_v21 = vpop.f32.mrf.mxu0  ;;  %v4337_v12 = vpop.permute.xlu0 %889  ;;  %v1308_v60 = vsel %vm1293_vm5, %v1275_v0, %v4150_v63 }
 0x1d6   : > { %1913 = vst.msk [vmem:[#allocation2 + $0x39] sm:$0xff] %vm1227_vm3, %v1825_v3  ;;  %v1824_v59 = vmax.f32 %v1673_v21, 0.0  ;;  %993 = vrot.lane.b32.xlu1 %v4326_v13, %s3037_s7  ;;  %v1341_v24 = vsel %vm1326_vm6, %v1308_v60, %v4182_v18  ;;  %v218_v60 = vld [vmem:[%s3115_s28 + $0x188] sm:$0xff] }
 0x1d7   : > { %707 = vrot.lane.b32.xlu0 %v4307_v57, %s3034_s4  ;;  %v1374_v56 = vsel %vm1359_vm7, %v1341_v24, %v4232_v25  ;;  %v432_v25 = vsel %vm352_vm1, %v429_v53, %v431_v31 }
 0x1d8   : > { %1912 = vst.msk [vmem:[#allocation2 + $0x31] sm:$0xff] %vm1227_vm3, %v1824_v59  ;;  %v1064_v9 = vpop.permute.xlu1 %1063  ;;  %v1407_v27 = vsel %vm1392_vm8, %v1374_v56, %v4294_v15 }
 0x1d9   : > { %v4347_v42 = vpop.permute.xlu0 %983  ;;  %v1440_v63 = vsel %vm1425_vm9, %v1407_v27, %v1064_v9 }
 0x1da   : > { %1087 = vrot.lane.b32.xlu1 %v349_v45, %s3038_s20 }
 0x1db   : > { %1073 = vrot.lane.b32.xlu0 %v3366_v26, %s3038_s20 }
 0x1dc   : > { %v4352_v49 = vpop.permute.xlu1 %685 }
 0x1dd   : > { %v4354_v1 = vpop.permute.xlu0 %605 }
 0x1de   : > { %709 = vrot.lane.b32.xlu1 %v4326_v13, %s3034_s4 }
 0x1df   : > { %1167 = vrot.lane.b32.xlu0 %v3771_v4, %s3039_s8  ;;  %v430_v4 = vsel %vm352_vm1, %v428_v19, %v429_v53 }
 0x1e0   : > { %v4363_v33 = vpop.permute.xlu1 %779 }
 0x1e1   : > { %v4365_v26 = vpop.permute.xlu0 %699 }
 0x1e2   : > { %1089 = vrot.lane.b32.xlu1 %v351_v17, %s3038_s20 }
 0x1e3   : > { %803 = vrot.lane.b32.xlu0 %v349_v45, %s3035_s5 }
 0x1e4   : > { %v1066_v7 = vpop.permute.xlu1 %1065 }
 0x1e5   : > { %v4379_v46 = vpop.permute.xlu0 %985 }
 0x1e6   : > { %1183 = vrot.lane.b32.xlu1 %v430_v4, %s3039_s8 }
 0x1e7   : > { %1169 = vrot.lane.b32.xlu0 %v3809_v58, %s3039_s8  ;;  %v2965_v58 = vld [vmem:[%s3115_s28 + $0xb0] sm:$0xff] }
 0x1e8   : > { %v1160_v16 = vpop.permute.xlu1 %1159  ;;  %v1243_v48 = vsel %vm1227_vm3, %v2965_v58, %v5014_v32  ;;  %v442_v32 = vrot.slane %v218_v60, 2 }
 0x1e9   : > { %v1473_v18 = vsel %vm1458_vm10, %v1440_v63, %v1160_v16  ;;  %v1080_v47 = vpop.permute.xlu0 %1079  ;;  %v1276_v3 = vsel %vm1260_vm4, %v1243_v48, %v4145_v22 }
 0x1ea   : > { %805 = vrot.lane.b32.xlu1 %v351_v17, %s3035_s5  ;;  %2835 = vmatprep.mubr.msk.f32.mxu0 %vm1496_vm11, %v1473_v18  ;;  %v1309_v59 = vsel %vm1293_vm5, %v1276_v3, %v4174_v40  ;;  %v1250_v40 = vsel %vm1227_vm3, %v4288_v61, %v5015_v30  ;;  %v5016_v18 = vld [vmem:[#allocation27_spill] sm:$0xff] }
 0x1eb   : > { %519 = vrot.lane.b32.xlu0 %v349_v45, %s3032_s29  ;;  %v1342_v52 = vsel %vm1326_vm6, %v1309_v59, %v4217_v8  ;;  %v217_v8 = vld [vmem:[%s3115_s28 + $0x180] sm:$0xff]  ;;  %v1283_v28 = vsel %vm1260_vm4, %v1250_v40, %v4152_v41 }
 0x1ec   : > { %v4394_v38 = vpop.permute.xlu1 %781  ;;  %v1375_v22 = vsel %vm1359_vm7, %v1342_v52, %v4279_v34  ;;  %v441_v58 = vrot.slane %v217_v8, 2 }
 0x1ed   : > { %v4396_v15 = vpop.permute.xlu0 %701  ;;  %v1408_v6 = vsel %vm1392_vm8, %v1375_v22, %v4335_v55 }
 0x1ee   : > { %1185 = vrot.lane.b32.xlu1 %v432_v25, %s3039_s8  ;;  %v1441_v34 = vsel %vm1425_vm9, %v1408_v6, %v1066_v7  ;;  %v437_v7 = vrot.slane %v218_v60, 1 }
 0x1ef   : > { %v2822_v21 = vpop.f32.mrf.mxu0  ;;  %899 = vrot.lane.b32.xlu0 %v430_v4, %s3036_s6 }
 0x1f0   : > { %v1827_v45 = vmax.f32 %v2822_v21, 0.0  ;;  %v4407_v9 = vpop.permute.xlu1 %875 }
 0x1f1   : > { %v1683_v62 = vpop.f32.mrf.mxu0  ;;  %v4411_v19 = vpop.permute.xlu0 %795 }
 0x1f2   : > { %1915 = vst.msk [vmem:[#allocation2 + $0x51] sm:$0xff] %vm1227_vm3, %v1827_v45  ;;  %v1826_v53 = vmax.f32 %v1683_v62, 0.0  ;;  %615 = vrot.lane.b32.xlu1 %v430_v4, %s3033_s30  ;;  %v1316_v4 = vsel %vm1293_vm5, %v1283_v28, %v4184_v29 }
 0x1f3   : > { %521 = vrot.lane.b32.xlu0 %v351_v17, %s3032_s29  ;;  %v1349_v55 = vsel %vm1326_vm6, %v1316_v4, %v4238_v23  ;;  %v436_v17 = vrot.slane %v217_v8, 1 }
 0x1f4   : > { %1914 = vst.msk [vmem:[#allocation2 + $0x49] sm:$0xff] %vm1227_vm3, %v1826_v53  ;;  %v1162_v0 = vpop.permute.xlu1 %1161  ;;  %v1382_v41 = vsel %vm1359_vm7, %v1349_v55, %v4298_v35 }
 0x1f5   : > { %v1474_v61 = vsel %vm1458_vm10, %v1441_v34, %v1162_v0  ;;  %v1082_v24 = vpop.permute.xlu0 %1081  ;;  %v1415_v29 = vsel %vm1392_vm8, %v1382_v41, %v4347_v42  ;;  %v438_v35 = vsel %vm271_vm0, %v436_v17, %v437_v7  ;;  %v219_v42 = vld [vmem:[%s3115_s28 + $0x190] sm:$0x3]  ;;  %v221_v34 = vld [vmem:[%s3115_s28 + $0x1a0] sm:$0xff]  ;;  %v222_v0 = vld [vmem:[%s3115_s28 + $0x1a8] sm:$0x3] }
 0x1f6   : > { %995 = vrot.lane.b32.xlu1 %v217_v8, %s3037_s7  ;;  %2836 = vmatmul.mubr.msk.f32.gmra.mxu0 %vm1496_vm11, %v1474_v61  ;;  %v1448_v27 = vsel %vm1425_vm9, %v1415_v29, %v1080_v47  ;;  %v1251_v47 = vsel %vm1227_vm3, %v4318_v51, %v5016_v18  ;;  %v439_v3 = vrot.slane %v219_v42, 1  ;;  %v220_v61 = vld [vmem:[%s3115_s28 + $0x198] sm:$0xff]  ;;  %v450_v55 = vrot.slane %v221_v34, 1 }
 0x1f7   : > { %901 = vrot.lane.b32.xlu0 %v432_v25, %s3036_s6  ;;  %v452_v41 = vrot.slane %v222_v0, 1 }
 0x1f8   : > { %v4441_v56 = vpop.permute.xlu1 %591 }
 0x1f9   : > { %v1176_v23 = vpop.permute.xlu0 %1175 }
 0x1fa   : > { %v1481_v31 = vsel %vm1458_vm10, %v1448_v27, %v1176_v23  ;;  %711 = vrot.lane.b32.xlu1 %v217_v8, %s3034_s4  ;;  %v455_v27 = vrot.slane %v221_v34, 2  ;;  %v453_v23 = vsel %vm271_vm0, %v450_v55, %v452_v41  ;;  %v1989_v41 = vld [vmem:[#allocation2 + $0x18] ss:$2 sm:$0xff] }
 0x1fb   : > { %617 = vrot.lane.b32.xlu0 %v432_v25, %s3033_s30  ;;  %2847 = vmatprep.mubr.msk.f32.mxu1 %vm1496_vm11, %v1481_v31  ;;  %v1284_v25 = vsel %vm1260_vm4, %v1251_v47, %v4176_v39  ;;  %v443_v39 = vsel %vm352_vm1, %v441_v58, %v442_v32  ;;  %v457_v31 = vrot.slane %v222_v0, 2  ;;  %v1976_v0 = vld [vmem:[#allocation2 + $0x32] ss:$2 sm:$0xff] }
 0x1fc   : > { %v4449_v63 = vpop.permute.xlu1 %877  ;;  %v1317_v21 = vsel %vm1293_vm5, %v1284_v25, %v4219_v54  ;;  %v440_v54 = vsel %vm271_vm0, %v437_v7, %v439_v3  ;;  %v449_v7 = vrot.slane %v220_v61, 1 }
 0x1fd   : > { %v4451_v16 = vpop.permute.xlu0 %797  ;;  %v1350_v45 = vsel %vm1326_vm6, %v1317_v21, %v4281_v44  ;;  %v458_v58 = vsel %vm352_vm1, %v455_v27, %v457_v31  ;;  %v2966_v21 = vld [vmem:[%s3115_s28 + $0xc0] sm:$0xff] }
 0x1fe   : > { %1091 = vrot.lane.b32.xlu1 %v438_v35, %s3038_s20  ;;  %v1383_v51 = vsel %vm1359_vm7, %v1350_v45, %v4337_v12  ;;  %v444_v12 = vrot.slane %v219_v42, 2  ;;  %v451_v18 = vsel %vm271_vm0, %v449_v7, %v450_v55  ;;  %v5017_v45 = vld [vmem:[#allocation22_spill] sm:$0xff] }
 0x1ff   : > { %997 = vrot.lane.b32.xlu0 %v218_v60, %s3037_s7  ;;  %v1416_v52 = vsel %vm1392_vm8, %v1383_v51, %v4379_v46  ;;  %v1244_v51 = vsel %vm1227_vm3, %v2966_v21, %v5017_v45  ;;  %v2005_v45 = vld [vmem:[#allocation2 + $0x19] ss:$2 sm:$0xff] }
 0x200   : > { %v4461_v48 = vpop.permute.xlu1 %971  ;;  %v1449_v22 = vsel %vm1425_vm9, %v1416_v52, %v1082_v24  ;;  %v445_v6 = vsel %vm352_vm1, %v442_v32, %v444_v12  ;;  %v1960_v12 = vld [vmem:[#allocation2 + $0x31] ss:$2 sm:$0xff] }
 0x201   : > { %v4465_v59 = vpop.permute.xlu0 %891 }
 0x202   : > { %807 = vrot.lane.b32.xlu1 %v438_v35, %s3035_s5  ;;  %v454_v35 = vrot.slane %v220_v61, 2 }
 0x203   : > { %713 = vrot.lane.b32.xlu0 %v218_v60, %s3034_s4 }
 0x204   : > { %v4476_v62 = vpop.permute.xlu1 %593  ;;  %v456_v25 = vsel %vm352_vm1, %v454_v35, %v455_v27 }
 0x205   : > { %v1178_v44 = vpop.permute.xlu0 %1177 }
 0x206   : > { %v1482_v53 = vsel %vm1458_vm10, %v1449_v22, %v1178_v44  ;;  %1187 = vrot.lane.b32.xlu1 %v443_v39, %s3039_s8  ;;  %v1958_v22 = vld [vmem:[#allocation2 + $0x1] ss:$2 sm:$0xff] }
 0x207   : > { %1093 = vrot.lane.b32.xlu0 %v440_v54, %s3038_s20  ;;  %2848 = vmatmul.mubr.msk.f32.gmra.mxu1 %vm1496_vm11, %v1482_v53 }
 0x208   : > { %v4484_v46 = vpop.permute.xlu1 %687 }
 0x209   : > { %v4486_v30 = vpop.permute.xlu0 %607 }
 0x20a   : > { %903 = vrot.lane.b32.xlu1 %v443_v39, %s3036_s6  ;;  %v1277_v39 = vsel %vm1260_vm4, %v1244_v51, %v4270_v14  ;;  %v5019_v51 = vld [vmem:[#allocation30_spill] sm:$0xff] }
 0x20b   : > { %v2825_v40 = vpop.f32.mrf.mxu0  ;;  %809 = vrot.lane.b32.xlu0 %v440_v54, %s3035_s5  ;;  %v1310_v52 = vsel %vm1293_vm5, %v1277_v39, %v4323_v5 }
 0x20c   : > { %v1829_v8 = vmax.f32 %v2825_v40, 0.0  ;;  %v4491_v28 = vpop.permute.xlu1 %973  ;;  %v1343_v44 = vsel %vm1326_vm6, %v1310_v52, %v4363_v33 }
 0x20d   : > { %v1693_v60 = vpop.f32.mrf.mxu0  ;;  %v4495_v4 = vpop.permute.xlu0 %893  ;;  %v1376_v40 = vsel %vm1359_vm7, %v1343_v44, %v4407_v9 }
 0x20e   : > { %1917 = vst.msk [vmem:[#allocation2 + $0x69] sm:$0xff] %vm1227_vm3, %v1829_v8  ;;  %v1828_v24 = vmax.f32 %v1693_v60, 0.0  ;;  %905 = vrot.lane.b32.xlu1 %v445_v6, %s3036_s6  ;;  %v1409_v14 = vsel %vm1392_vm8, %v1376_v40, %v4461_v48  ;;  %v1974_v8 = vld [vmem:[#allocation2 + $0x2] ss:$2 sm:$0xff] }
 0x20f   : > { %1189 = vrot.lane.b32.xlu0 %v445_v6, %s3039_s8  ;;  %v1991_v48 = vld [vmem:[#allocation2 + $0x48] ss:$2 sm:$0xff] }
 0x210   : > { %1916 = vst.msk [vmem:[#allocation2 + $0x61] sm:$0xff] %vm1227_vm3, %v1828_v24  ;;  %v1068_v17 = vpop.permute.xlu1 %1067  ;;  %v5018_v24 = vld [vmem:[#allocation21_spill] sm:$0xff] }
 0x211   : > { %v4502_v29 = vpop.permute.xlu0 %987  ;;  %v1442_v5 = vsel %vm1425_vm9, %v1409_v14, %v1068_v17  ;;  %v2021_v14 = vld [vmem:[#allocation2 + $0x1a] ss:$2 sm:$0xff] }
 0x212   : > { %1001 = vrot.lane.b32.xlu1 %v221_v34, %s3037_s7 }
 0x213   : > { %999 = vrot.lane.b32.xlu0 %v220_v61, %s3037_s7  ;;  %v2967_v61 = vld [vmem:[%s3115_s28 + $0xc8] sm:$0xff] }
 0x214   : > { %v4507_v42 = vpop.permute.xlu1 %689  ;;  %v1245_v55 = vsel %vm1227_vm3, %v2967_v61, %v5018_v24 }
 0x215   : > { %v4510_v47 = vpop.permute.xlu0 %609  ;;  %v1278_v17 = vsel %vm1260_vm4, %v1245_v55, %v4311_v37 }
 0x216   : > { %1097 = vrot.lane.b32.xlu1 %v453_v23, %s3038_s20  ;;  %v1311_v27 = vsel %vm1293_vm5, %v1278_v17, %v4352_v49  ;;  %v2968_v49 = vld [vmem:[%s3115_s28 + $0x120] sm:$0xff] }
 0x217   : > { %1095 = vrot.lane.b32.xlu0 %v451_v18, %s3038_s20  ;;  %v1344_v35 = vsel %vm1326_vm6, %v1311_v27, %v4394_v38  ;;  %v1252_v39 = vsel %vm1227_vm3, %v2968_v49, %v5019_v51  ;;  %v2069_v49 = vld [vmem:[#allocation2 + $0x32] ss:$2 sm:$0xff] }
 0x218   : > { %v4515_v32 = vpop.permute.xlu1 %783  ;;  %v1377_v21 = vsel %vm1359_vm7, %v1344_v35, %v4449_v63  ;;  %v1285_v52 = vsel %vm1260_vm4, %v1252_v39, %v4328_v36  ;;  %v2007_v36 = vld [vmem:[#allocation2 + $0x49] ss:$2 sm:$0xff] }
 0x219   : > { %v4518_v3 = vpop.permute.xlu0 %703  ;;  %v1410_v38 = vsel %vm1392_vm8, %v1377_v21, %v4491_v28  ;;  %v1318_v44 = vsel %vm1293_vm5, %v1285_v52, %v4365_v26  ;;  %v5021_v52 = vld [vmem:[#allocation24_spill] sm:$0xff] }
 0x21a   : > { %1193 = vrot.lane.b32.xlu1 %v458_v58, %s3039_s8  ;;  %v1351_v28 = vsel %vm1326_vm6, %v1318_v44, %v4411_v19  ;;  %v2969_v19 = vld [vmem:[%s3115_s28 + $0x128] sm:$0xff] }
 0x21b   : > { %1191 = vrot.lane.b32.xlu0 %v456_v25, %s3039_s8  ;;  %v1962_v25 = vld [vmem:[#allocation2 + $0x61] ss:$2 sm:$0xff] }
 0x21c   : > { %v1070_v54 = vpop.permute.xlu1 %1069 }
 0x21d   : > { %v4531_v53 = vpop.permute.xlu0 %989  ;;  %v1443_v63 = vsel %vm1425_vm9, %v1410_v38, %v1070_v54  ;;  %v1384_v54 = vsel %vm1359_vm7, %v1351_v28, %v4465_v59 }
 0x21e   : > { %2094 = vrot.lane.b32.xlu1 %v1960_v12, %s3032_s29  ;;  %v1417_v26 = vsel %vm1392_vm8, %v1384_v54, %v4502_v29 }
 0x21f   : > { %2092 = vrot.lane.b32.xlu0 %v1958_v22, %s3032_s29 }
 0x220   : > { %v1164_v6 = vpop.permute.xlu1 %1163 }
 0x221   : > { %v1475_v33 = vsel %vm1458_vm10, %v1442_v5, %v1164_v6  ;;  %v1084_v34 = vpop.permute.xlu0 %1083 }
 0x222   : > { %2126 = vrot.lane.b32.xlu1 %v1976_v0, %s3033_s30  ;;  %2838 = vmatprep.mubr.msk.f32.mxu0 %vm1496_vm11, %v1475_v33  ;;  %v1450_v6 = vsel %vm1425_vm9, %v1417_v26, %v1084_v34  ;;  %v1978_v33 = vld [vmem:[#allocation2 + $0x62] ss:$2 sm:$0xff]  ;;  %v5020_v0 = vld [vmem:[#allocation29_spill] sm:$0xff] }
 0x223   : > { %2124 = vrot.lane.b32.xlu0 %v1974_v8, %s3033_s30 }
 0x224   : > { %v4544_v9 = vpop.permute.xlu1 %785 }
 0x225   : > { %v4546_v60 = vpop.permute.xlu0 %705 }
 0x226   : > { %2158 = vrot.lane.b32.xlu1 %v1991_v48, %s3034_s4  ;;  %v1253_v48 = vsel %vm1227_vm3, %v2969_v19, %v5020_v0  ;;  %v5023_v0 = vld [vmem:[#allocation23_spill] sm:$0xff] }
 0x227   : > { %v2828_v7 = vpop.f32.mrf.mxu0  ;;  %2156 = vrot.lane.b32.xlu0 %v1989_v41, %s3034_s4  ;;  %v1286_v59 = vsel %vm1260_vm4, %v1253_v48, %v4354_v1  ;;  %v2037_v41 = vld [vmem:[#allocation2 + $0x30] ss:$2 sm:$0xff] }
 0x228   : > { %v1831_v23 = vmax.f32 %v2828_v7, 0.0  ;;  %v4557_v31 = vpop.permute.xlu1 %879  ;;  %v1319_v29 = vsel %vm1293_vm5, %v1286_v59, %v4396_v15 }
 0x229   : > { %v1703_v18 = vpop.f32.mrf.mxu0  ;;  %v4561_v58 = vpop.permute.xlu0 %799  ;;  %v1352_v34 = vsel %vm1326_vm6, %v1319_v29, %v4451_v16 }
 0x22a   : > { %1919 = vst.msk [vmem:[#allocation2 + $0x81] sm:$0xff] %vm1227_vm3, %v1831_v23  ;;  %v1830_v37 = vmax.f32 %v1703_v18, 0.0  ;;  %2096 = vrot.lane.b32.xlu1 %v1962_v25, %s3032_s29  ;;  %v1385_v17 = vsel %vm1359_vm7, %v1352_v34, %v4495_v4  ;;  %v2053_v4 = vld [vmem:[#allocation2 + $0x31] ss:$2 sm:$0xff] }
 0x22b   : > { %2188 = vrot.lane.b32.xlu0 %v2005_v45, %s3035_s5  ;;  %v1418_v7 = vsel %vm1392_vm8, %v1385_v17, %v4531_v53 }
 0x22c   : > { %1918 = vst.msk [vmem:[#allocation2 + $0x79] sm:$0xff] %vm1227_vm3, %v1830_v37  ;;  %v1166_v22 = vpop.permute.xlu1 %1165 }
 0x22d   : > { %v1476_v12 = vsel %vm1458_vm10, %v1443_v63, %v1166_v22  ;;  %v1086_v40 = vpop.permute.xlu0 %1085  ;;  %v1246_v63 = vsel %vm1227_vm3, %v3984_v2, %v5021_v52  ;;  %v2039_v52 = vld [vmem:[#allocation2 + $0x60] ss:$2 sm:$0xff] }
 0x22e   : > { %2220 = vrot.lane.b32.xlu1 %v2021_v14, %s3036_s6  ;;  %2839 = vmatmul.mubr.msk.f32.gmra.mxu0 %vm1496_vm11, %v1476_v12  ;;  %v1451_v1 = vsel %vm1425_vm9, %v1418_v7, %v1086_v40  ;;  %v1279_v44 = vsel %vm1260_vm4, %v1246_v63, %v4441_v56 }
 0x22f   : > { %2190 = vrot.lane.b32.xlu0 %v2007_v36, %s3035_s5  ;;  %v1312_v14 = vsel %vm1293_vm5, %v1279_v44, %v4484_v46  ;;  %v5022_v46 = vld [vmem:[#allocation32_spill] sm:$0xff] }
 0x230   : > { %v4589_v5 = vpop.permute.xlu1 %801  ;;  %v1345_v54 = vsel %vm1326_vm6, %v1312_v14, %v4515_v32  ;;  %v1247_v32 = vsel %vm1227_vm3, %v4020_v20, %v5023_v0  ;;  %v5025_v14 = vld [vmem:[#allocation34_spill] sm:$0xff] }
 0x231   : > { %v1180_v8 = vpop.permute.xlu0 %1179  ;;  %v1378_v26 = vsel %vm1359_vm7, %v1345_v54, %v4557_v31  ;;  %v1280_v48 = vsel %vm1260_vm4, %v1247_v32, %v4476_v62  ;;  %v2408_v32 = vld [vmem:[%s4943_s2 + $0x20] sm:$0xf] }
 0x232   : > { %v1483_v61 = vsel %vm1458_vm10, %v1450_v6, %v1180_v8  ;;  %2128 = vrot.lane.b32.xlu1 %v1978_v33, %s3033_s30  ;;  %v1254_v33 = vsel %vm1227_vm3, %v4034_v10, %v5022_v46  ;;  %v1313_v10 = vsel %vm1293_vm5, %v1280_v48, %v4507_v42  ;;  %2862 = vmatprep.subr.msk.mxu1 %vm1593_vm2, %v2408_v32 }
 0x233   : > { %2850 = vmatprep.mubr.msk.f32.mxu1 %vm1496_vm11, %v1483_v61  ;;  %v1993_v35 = vld [vmem:[#allocation2 + $0x78] ss:$2 sm:$0xff]  ;;  %v2009_v21 = vld [vmem:[#allocation2 + $0x79] ss:$2 sm:$0xff]  ;;  %v1287_v31 = vsel %vm1260_vm4, %v1254_v33, %v4486_v30  ;;  %v1346_v20 = vsel %vm1326_vm6, %v1313_v10, %v4544_v9  ;;  %v5024_v9 = vld [vmem:[#allocation31_spill] sm:$0xff]  ;;  %2863 = vmatpush3.msk.msra.mxu1 %vm1593_vm2, %v2408_v32 }
 0x234   : > { %v896_v24 = vpop.permute.xlu1 %895  ;;  %v1320_v61 = vsel %vm1293_vm5, %v1287_v31, %v4518_v3 }
 0x235   : > { %v882_v55 = vpop.permute.xlu0 %881  ;;  %v1353_v29 = vsel %vm1326_vm6, %v1320_v61, %v4561_v58 }
 0x236   : > { %2252 = vrot.lane.b32.xlu1 %v2037_v41, %s3037_s7  ;;  %v1386_v30 = vsel %vm1359_vm7, %v1353_v29, %v896_v24  ;;  %v1379_v17 = vsel %vm1359_vm7, %v1346_v20, %v882_v55  ;;  %v1255_v24 = vsel %vm1227_vm3, %v4057_v11, %v5024_v9  ;;  %v2406_v20 = vld [vmem:[%s4943_s2 + $0x10] sm:$0xff] }
 0x238   : > { %v1182_v27 = vpop.permute.xlu1 %1181 }
 0x239   : > { %v1484_v23 = vsel %vm1458_vm10, %v1451_v1, %v1182_v27  ;;  %v976_v15 = vpop.permute.xlu0 %975 }
 0x23a   : > { %2160 = vrot.lane.b32.xlu1 %v1993_v35, %s3034_s4  ;;  %2851 = vmatmul.mubr.msk.f32.gmra.mxu1 %vm1496_vm11, %v1484_v23  ;;  %v1411_v2 = vsel %vm1392_vm8, %v1378_v26, %v976_v15  ;;  %v2023_v23 = vld [vmem:[#allocation2 + $0x4a] ss:$2 sm:$0xff]  ;;  %v1288_v15 = vsel %vm1260_vm4, %v1255_v24, %v4510_v47 }
 0x23b   : > { %v1321_v35 = vsel %vm1293_vm5, %v1288_v15, %v4546_v60 }
 0x23c   : > { %v4613_v16 = vpop.permute.xlu1 %897 }
 0x23d   : > { %v4615_v18 = vpop.permute.xlu0 %611 }
 0x23e   : > { %2284 = vrot.lane.b32.xlu1 %v2053_v4, %s3038_s20 }
 0x240   : > { %v992_v25 = vpop.permute.xlu1 %991 }
 0x241   : > { %v978_v53 = vpop.permute.xlu0 %977  ;;  %v1419_v62 = vsel %vm1392_vm8, %v1386_v30, %v992_v25  ;;  %v1354_v25 = vsel %vm1326_vm6, %v1321_v35, %v4589_v5 }
 0x242   : > { %2192 = vrot.lane.b32.xlu1 %v2009_v21, %s3035_s5  ;;  %v1412_v3 = vsel %vm1392_vm8, %v1379_v17, %v978_v53  ;;  %v1387_v53 = vsel %vm1359_vm7, %v1354_v25, %v4613_v16 }
 0x244   : > { %v4619_v37 = vpop.permute.xlu1 %613 }
 0x245   : > { %v1072_v45 = vpop.permute.xlu0 %1071 }
 0x246   : > { %2316 = vrot.lane.b32.xlu1 %v2069_v49, %s3039_s8  ;;  %v1444_v6 = vsel %vm1425_vm9, %v1411_v2, %v1072_v45 }
 0x248   : > { %v994_v51 = vpop.permute.xlu1 %993 }
 0x249   : > { %v4622_v39 = vpop.permute.xlu0 %707  ;;  %v1420_v45 = vsel %vm1392_vm8, %v1387_v53, %v994_v51 }
 0x24a   : > { %v2831_v38 = vpop.f32.mrf.mxu0 }
 0x24b   : > { %v1833_v22 = vmax.f32 %v2831_v38, 0.0 }
 0x24c   : > { %v1088_v12 = vpop.permute.xlu1 %1087  ;;  %v1713_v40 = vpop.f32.mrf.mxu0 }
 0x24d   : > { %1921 = vst.msk [vmem:[#allocation2 + $0x99] sm:$0xff] %vm1227_vm3, %v1833_v22  ;;  %v1832_v28 = vmax.f32 %v1713_v40, 0.0  ;;  %v1074_v36 = vpop.permute.xlu0 %1073  ;;  %v1452_v42 = vsel %vm1425_vm9, %v1419_v62, %v1088_v12 }
 0x24e   : > { %v1445_v58 = vsel %vm1425_vm9, %v1412_v3, %v1074_v36 }
 0x24f   : > { %1920 = vst.msk [vmem:[#allocation2 + $0x91] sm:$0xff] %vm1227_vm3, %v1832_v28  ;;  %v1256_v28 = vsel %vm1227_vm3, %v4165_v43, %v5025_v14 }
 0x250   : > { %v4638_v56 = vpop.permute.xlu1 %709  ;;  %v1289_v36 = vsel %vm1260_vm4, %v1256_v28, %v4615_v18  ;;  %v5026_v18 = vld [vmem:[#allocation33_spill] sm:$0xff] }
 0x251   : > { %v1168_v8 = vpop.permute.xlu0 %1167  ;;  %v1322_v54 = vsel %vm1293_vm5, %v1289_v36, %v4622_v39  ;;  %v1257_v39 = vsel %vm1227_vm3, %v4194_v50, %v5026_v18  ;;  %v2407_v50 = vld [vmem:[%s4943_s2 + $0x18] sm:$0xff] }
 0x252   : > { %v1477_v19 = vsel %vm1458_vm10, %v1444_v6, %v1168_v8  ;;  %v1290_v31 = vsel %vm1260_vm4, %v1257_v39, %v4619_v37  ;;  %2864 = vmatprep.subr.mxu1 %v2407_v50  ;;  %v1944_v36 = vld [vmem:[#allocation2 + $0x30] ss:$2 sm:$0xff] }
 0x253   : > { %2841 = vmatprep.mubr.msk.f32.mxu0 %vm1496_vm11, %v1477_v19  ;;  %v1323_v61 = vsel %vm1293_vm5, %v1290_v31, %v4638_v56  ;;  %2865 = vmatpush3.msra.mxu1 %v2407_v50  ;;  %v2405_v56 = vld [vmem:[%s4943_s2 + $0x8] sm:$0xff] }
 0x254   : > { %v1090_v59 = vpop.permute.xlu1 %1089  ;;  %2866 = vmatprep.subr.mxu1 %v2406_v20 }
 0x255   : > { %v804_v34 = vpop.permute.xlu0 %803  ;;  %v1453_v47 = vsel %vm1425_vm9, %v1420_v45, %v1090_v59  ;;  %2867 = vmatpush3.msra.mxu1 %v2406_v20 }
 0x256   : > { %v1964_v41 = vld [vmem:[#allocation2 + $0x91] ss:$2 sm:$0xff]  ;;  %v1980_v21 = vld [vmem:[#allocation2 + $0x92] ss:$2 sm:$0xff]  ;;  %v1355_v2 = vsel %vm1326_vm6, %v1322_v54, %v804_v34  ;;  %2868 = vmatprep.subr.mxu1 %v2405_v56 }
 0x257   : > { %2098 = vrot.lane.b32.xlu0 %v1964_v41, %s3032_s29  ;;  %2869 = vmatpush3.msra.mxu1 %v2405_v56 }
 0x258   : > { %v1184_v7 = vpop.permute.xlu1 %1183 }
 0x259   : > { %v1485_v1 = vsel %vm1458_vm10, %v1452_v42, %v1184_v7  ;;  %v1170_v27 = vpop.permute.xlu0 %1169 }
 0x25a   : > { %v1478_v55 = vsel %vm1458_vm10, %v1445_v58, %v1170_v27  ;;  %2853 = vmatprep.mubr.msk.f32.mxu1 %vm1496_vm11, %v1485_v1  ;;  %v2404_v58 = vld [vmem:[%s4943_s2] sm:$0xff] }
 0x25b   : > { %2842 = vmatmul.mubr.msk.f32.gmra.mxu0 %vm1496_vm11, %v1478_v55  ;;  %2222 = vrot.lane.b32.xlu0 %v2023_v23, %s3036_s6 }
 0x25c   : > { %v806_v4 = vpop.permute.xlu1 %805  ;;  %2870 = vmatprep.subr.mxu1 %v2404_v58 }
 0x25d   : > { %v4682_v11 = vpop.permute.xlu0 %519  ;;  %v1356_v10 = vsel %vm1326_vm6, %v1323_v61, %v806_v4  ;;  %2871 = vmatpush3.msra.mxu1 %v2404_v58 }
 0x25e   : > { %v1258_v9 = vsel %vm1227_vm3, %v4307_v57, %v4682_v11 }
 0x25f   : > { %2130 = vrot.lane.b32.xlu0 %v1980_v21, %s3033_s30 }
 0x260   : > { %v1186_v49 = vpop.permute.xlu1 %1185 }
 0x261   : > { %v1486_v38 = vsel %vm1458_vm10, %v1453_v47, %v1186_v49  ;;  %v900_v60 = vpop.permute.xlu0 %899 }
 0x262   : > { %2854 = vmatmul.mubr.msk.f32.gmra.mxu1 %vm1496_vm11, %v1486_v38  ;;  %v1388_v8 = vsel %vm1359_vm7, %v1355_v2, %v900_v60 }
 0x263   : > { %2254 = vrot.lane.b32.xlu0 %v2039_v52, %s3037_s7 }
 0x264   : > { %v616_v5 = vpop.permute.xlu1 %615 }
 0x265   : > { %v522_v63 = vpop.permute.xlu0 %521  ;;  %v1291_v23 = vsel %vm1260_vm4, %v1258_v9, %v616_v5 }
 0x266   : > { %v1259_v1 = vsel %vm1227_vm3, %v4326_v13, %v522_v63 }
 0x268   : > { %v996_v22 = vpop.permute.xlu1 %995 }
 0x269   : > { %v902_v16 = vpop.permute.xlu0 %901  ;;  %v1421_v46 = vsel %vm1392_vm8, %v1388_v8, %v996_v22 }
 0x26a   : > { %v1389_v34 = vsel %vm1359_vm7, %v1356_v10, %v902_v16  ;;  %v2071_v16 = vld [vmem:[#allocation2 + $0x62] ss:$2 sm:$0xff] }
 0x26c   : > { %v712_v44 = vpop.permute.xlu1 %711 }
 0x26d   : > { %v618_v12 = vpop.permute.xlu0 %617  ;;  %v1324_v4 = vsel %vm1293_vm5, %v1291_v23, %v712_v44 }
 0x26e   : > { %v1292_v55 = vsel %vm1260_vm4, %v1259_v1, %v618_v12  ;;  %v2055_v12 = vld [vmem:[#allocation2 + $0x61] ss:$2 sm:$0xff] }
 0x270   : > { %v1092_v51 = vpop.permute.xlu1 %1091 }
 0x271   : > { %v998_v40 = vpop.permute.xlu0 %997  ;;  %v1454_v33 = vsel %vm1425_vm9, %v1421_v46, %v1092_v51 }
 0x272   : > { %v1422_v30 = vsel %vm1392_vm8, %v1389_v34, %v998_v40 }
 0x274   : > { %v808_v26 = vpop.permute.xlu1 %807 }
 0x275   : > { %v714_v6 = vpop.permute.xlu0 %713  ;;  %v1357_v53 = vsel %vm1326_vm6, %v1324_v4, %v808_v26 }
 0x276   : > { %v1325_v15 = vsel %vm1293_vm5, %v1292_v55, %v714_v6 }
 0x278   : > { %v1188_v19 = vpop.permute.xlu1 %1187 }
 0x279   : > { %v1487_v0 = vsel %vm1458_vm10, %v1454_v33, %v1188_v19  ;;  %v1094_v43 = vpop.permute.xlu0 %1093 }
 0x27a   : > { %2856 = vmatprep.mubr.msk.f32.mxu1 %vm1496_vm11, %v1487_v0  ;;  %v1455_v62 = vsel %vm1425_vm9, %v1422_v30, %v1094_v43  ;;  %v1946_v0 = vld [vmem:[#allocation2 + $0x60] ss:$2 sm:$0xff] }
 0x27c   : > { %v904_v48 = vpop.permute.xlu1 %903 }
 0x27d   : > { %v810_v59 = vpop.permute.xlu0 %809  ;;  %v1390_v45 = vsel %vm1359_vm7, %v1357_v53, %v904_v48  ;;  %v1942_v48 = vld [vmem:[#allocation2] ss:$2 sm:$0xff] }
 0x27e   : > { %v2834_v29 = vpop.f32.mrf.mxu0  ;;  %v1358_v13 = vsel %vm1326_vm6, %v1325_v15, %v810_v59  ;;  %v2041_v15 = vld [vmem:[#allocation2 + $0x90] ss:$2 sm:$0xff] }
 0x27f   : > { %v1835_v37 = vmax.f32 %v2834_v29, 0.0 }
 0x280   : > { %v906_v41 = vpop.permute.xlu1 %905  ;;  %v1723_v17 = vpop.f32.mrf.mxu0 }
 0x281   : > { %1923 = vst.msk [vmem:[#allocation2 + $0xb1] sm:$0xff] %vm1227_vm3, %v1835_v37  ;;  %v1834_v3 = vmax.f32 %v1723_v17, 0.0  ;;  %v1190_v42 = vpop.permute.xlu0 %1189  ;;  %v1391_v21 = vsel %vm1359_vm7, %v1358_v13, %v906_v41 }
 0x282   : > { %v1488_v7 = vsel %vm1458_vm10, %v1455_v62, %v1190_v42 }
 0x283   : > { %1922 = vst.msk [vmem:[#allocation2 + $0xa9] sm:$0xff] %vm1227_vm3, %v1834_v3  ;;  %2857 = vmatmul.mubr.msk.f32.gmra.mxu1 %vm1496_vm11, %v1488_v7 }
 0x284   : > { %v1002_v27 = vpop.permute.xlu1 %1001 }
 0x285   : > { %v1000_v24 = vpop.permute.xlu0 %999  ;;  %v1424_v47 = vsel %vm1392_vm8, %v1391_v21, %v1002_v27 }
 0x286   : > { %v1423_v49 = vsel %vm1392_vm8, %v1390_v45, %v1000_v24 }
 0x288   : > { %v1098_v35 = vpop.permute.xlu1 %1097 }
 0x289   : > { %v1096_v25 = vpop.permute.xlu0 %1095  ;;  %v1457_v38 = vsel %vm1425_vm9, %v1424_v47, %v1098_v35  ;;  %v2025_v35 = vld [vmem:[#allocation2 + $0x7a] ss:$2 sm:$0xff] }
 0x28a   : > { %v2011_v57 = vld [vmem:[#allocation2 + $0xa9] ss:$2 sm:$0xff]  ;;  %v1995_v11 = vld [vmem:[#allocation2 + $0xa8] ss:$2 sm:$0xff]  ;;  %v1456_v52 = vsel %vm1425_vm9, %v1423_v49, %v1096_v25 }
 0x28b   : > { %2194 = vrot.lane.b32.xlu1 %v2011_v57, %s3035_s5  ;;  %2162 = vrot.lane.b32.xlu0 %v1995_v11, %s3034_s4  ;;  %v1948_v11 = vld [vmem:[#allocation2 + $0x90] ss:$2 sm:$0xff] }
 0x28c   : > { %v1194_v60 = vpop.permute.xlu1 %1193 }
 0x28d   : > { %v1490_v5 = vsel %vm1458_vm10, %v1457_v38, %v1194_v60  ;;  %v1192_v63 = vpop.permute.xlu0 %1191 }
 0x28e   : > { %v1489_v22 = vsel %vm1458_vm10, %v1456_v52, %v1192_v63 }
 0x28f   : > { %v2846_v44 = vpop.f32.mrf.mxu1  ;;  %2859 = vmatprep.mubr.msk.f32.mxu1 %vm1496_vm11, %v1489_v22  ;;  %2318 = vrot.lane.b32.xlu1 %v2071_v16, %s3039_s8 }
 0x290   : > { %v1843_v51 = vmax.f32 %v2846_v44, 0.0  ;;  %2286 = vrot.lane.b32.xlu0 %v2055_v12, %s3038_s20  ;;  %2860 = vmatmul.mubr.msk.f32.gmra.mxu1 %vm1496_vm11, %v1490_v5  ;;  %v2095_v40 = vpop.permute.xlu1 %2094 }
 0x291   : > { %v1763_v14 = vpop.f32.mrf.mxu1  ;;  %v2341_v54 = vsel %vm1227_vm3, %v1944_v36, %v2095_v40  ;;  %v2093_v33 = vpop.permute.xlu0 %2092  ;;  %v2057_v36 = vld [vmem:[#allocation2 + $0x91] ss:$2 sm:$0xff] }
 0x292   : > { %1931 = vst.msk [vmem:[#allocation2 + $0x111] sm:$0xff] %vm1227_vm3, %v1843_v51  ;;  %v1842_v28 = vmax.f32 %v1763_v14, 0.0  ;;  %v2340_v10 = vsel %vm1227_vm3, %v1942_v48, %v2093_v33 }
 0x294   : > { %1930 = vst.msk [vmem:[#allocation2 + $0x109] sm:$0xff] %vm1227_vm3, %v1842_v28  ;;  %v2127_v26 = vpop.permute.xlu1 %2126 }
 0x295   : > { %v2349_v2 = vsel %vm1260_vm4, %v2341_v54, %v2127_v26  ;;  %v2125_v32 = vpop.permute.xlu0 %2124 }
 0x296   : > { %v2348_v34 = vsel %vm1260_vm4, %v2340_v10, %v2125_v32 }
 0x298   : > { %v2159_v6 = vpop.permute.xlu1 %2158 }
 0x299   : > { %v4767_v8 = vsel %vm1293_vm5, %v2349_v2, %v2159_v6  ;;  %v2157_v61 = vpop.permute.xlu0 %2156 }
 0x29a   : > { %v2356_v20 = vsel %vm1293_vm5, %v2348_v34, %v2157_v61 }
 0x29c   : > { %v2097_v46 = vpop.permute.xlu1 %2096 }
 0x29d   : > { %v2342_v43 = vsel %vm1227_vm3, %v1946_v0, %v2097_v46  ;;  %v2189_v37 = vpop.permute.xlu0 %2188 }
 0x29e   : > { %v2364_v30 = vsel %vm1326_vm6, %v2356_v20, %v2189_v37 }
 0x2a0   : > { %v2221_v19 = vpop.permute.xlu1 %2220 }
 0x2a1   : > { %v2372_v17 = vsel %vm1359_vm7, %v2364_v30, %v2221_v19  ;;  %v2191_v23 = vpop.permute.xlu0 %2190  ;;  %v2027_v30 = vld [vmem:[#allocation2 + $0xaa] ss:$2 sm:$0xff] }
 0x2a2   : > { %v2365_v26 = vsel %vm1326_vm6, %v4767_v8, %v2191_v23 }
 0x2a4   : > { %v2129_v18 = vpop.permute.xlu1 %2128 }
 0x2a5   : > { %v2350_v39 = vsel %vm1260_vm4, %v2342_v43, %v2129_v18  ;;  %v2073_v18 = vld [vmem:[#allocation2 + $0x92] ss:$2 sm:$0xff] }
 0x2a8   : > { %v2253_v31 = vpop.permute.xlu1 %2252 }
 0x2a9   : > { %v2380_v3 = vsel %vm1392_vm8, %v2372_v17, %v2253_v31 }
 0x2ac   : > { %v2161_v59 = vpop.permute.xlu1 %2160 }
 0x2ad   : > { %v2358_v50 = vsel %vm1293_vm5, %v2350_v39, %v2161_v59  ;;  %v2015_v39 = vld [vmem:[#allocation2 + $0x109] ss:$2 sm:$0xff] }
 0x2b0   : > { %v2285_v29 = vpop.permute.xlu1 %2284 }
 0x2b1   : > { %v2388_v7 = vsel %vm1425_vm9, %v2380_v3, %v2285_v29 }
 0x2b4   : > { %v2193_v56 = vpop.permute.xlu1 %2192 }
 0x2b5   : > { %v4777_v41 = vsel %vm1326_vm6, %v2358_v50, %v2193_v56 }
 0x2b6   : > { %v2837_v62 = vpop.f32.mrf.mxu0 }
 0x2b7   : > { %v1837_v42 = vmax.f32 %v2837_v62, 0.0 }
 0x2b8   : > { %v2317_v58 = vpop.permute.xlu1 %2316  ;;  %v1733_v1 = vpop.f32.mrf.mxu0 }
 0x2b9   : > { %1925 = vst.msk [vmem:[#allocation2 + $0xc9] sm:$0xff] %vm1227_vm3, %v1837_v42  ;;  %v2396_v27 = vsel %vm1458_vm10, %v2388_v7, %v2317_v58  ;;  %v1836_v9 = vmax.f32 %v1733_v1, 0.0 }
 0x2ba   : > { %2872 = vmatprep.mubr.msk.f32.mxu1 %vm1496_vm11, %v2396_v27 }
 0x2bb   : > { %1924 = vst.msk [vmem:[#allocation2 + $0xc1] sm:$0xff] %vm1227_vm3, %v1836_v9 }
 0x2c2   : > { %v1982_v24 = vld [vmem:[#allocation2 + $0xc2] ss:$2 sm:$0xff]  ;;  %v1966_v55 = vld [vmem:[#allocation2 + $0xc1] ss:$2 sm:$0xff] }
 0x2c3   : > { %2132 = vrot.lane.b32.xlu1 %v1982_v24, %s3033_s30  ;;  %2100 = vrot.lane.b32.xlu0 %v1966_v55, %s3032_s29  ;;  %v2075_v8 = vld [vmem:[#allocation2 + $0xc2] ss:$2 sm:$0xff] }
 0x2c4   : > { %v2043_v42 = vld [vmem:[#allocation2 + $0xc0] ss:$2 sm:$0xff] }
 0x2c5   : > { %v1950_v58 = vld [vmem:[#allocation2 + $0xc0] ss:$2 sm:$0xff] }
 0x2c6   : > { %v1999_v24 = vld [vmem:[#allocation2 + $0x108] ss:$2 sm:$0xff] }
 0x2c7   : > { %v2849_v4 = vpop.f32.mrf.mxu1  ;;  %2256 = vrot.lane.b32.xlu1 %v2041_v15, %s3037_s7  ;;  %2224 = vrot.lane.b32.xlu0 %v2025_v35, %s3036_s6  ;;  %v2059_v15 = vld [vmem:[#allocation2 + $0xc1] ss:$2 sm:$0xff] }
 0x2c8   : > { %v1845_v13 = vmax.f32 %v2849_v4, 0.0 }
 0x2c9   : > { %v1773_v25 = vpop.f32.mrf.mxu1  ;;  %v2099_v53 = vpop.permute.xlu0 %2098 }
 0x2ca   : > { %1933 = vst.msk [vmem:[#allocation2 + $0x129] sm:$0xff] %vm1227_vm3, %v1845_v13  ;;  %v1844_v21 = vmax.f32 %v1773_v25, 0.0  ;;  %v2343_v45 = vsel %vm1227_vm3, %v1948_v11, %v2099_v53  ;;  %v2031_v11 = vld [vmem:[#allocation2 + $0x10a] ss:$2 sm:$0xff] }
 0x2cc   : > { %1932 = vst.msk [vmem:[#allocation2 + $0x121] sm:$0xff] %vm1227_vm3, %v1844_v21 }
 0x2cd   : > { %v2223_v57 = vpop.permute.xlu0 %2222 }
 0x2ce   : > { %v2373_v2 = vsel %vm1359_vm7, %v2365_v26, %v2223_v57 }
 0x2d1   : > { %v2131_v47 = vpop.permute.xlu0 %2130 }
 0x2d2   : > { %v2351_v49 = vsel %vm1260_vm4, %v2343_v45, %v2131_v47 }
 0x2d3   : > { %v1986_v32 = vld [vmem:[#allocation2 + $0x122] ss:$2 sm:$0xff]  ;;  %v1970_v35 = vld [vmem:[#allocation2 + $0x121] ss:$2 sm:$0xff] }
 0x2d5   : > { %v2255_v63 = vpop.permute.xlu0 %2254 }
 0x2d6   : > { %v2381_v46 = vsel %vm1392_vm8, %v2373_v2, %v2255_v63 }
 0x2ee   : > { %v2840_v38 = vpop.f32.mrf.mxu0 }
 0x2ef   : > { %v1839_v60 = vmax.f32 %v2840_v38, 0.0 }
 0x2f0   : > { %v1743_v52 = vpop.f32.mrf.mxu0 }
 0x2f1   : > { %1927 = vst.msk [vmem:[#allocation2 + $0xe1] sm:$0xff] %vm1227_vm3, %v1839_v60  ;;  %v1838_v5 = vmax.f32 %v1743_v52, 0.0 }
 0x2f3   : > { %1926 = vst.msk [vmem:[#allocation2 + $0xd9] sm:$0xff] %vm1227_vm3, %v1838_v5  ;;  %v2047_v5 = vld [vmem:[#allocation2 + $0x120] ss:$2 sm:$0xff] }
 0x2fa   : > { %v2852_v22 = vpop.f32.mrf.mxu1  ;;  %v1997_v16 = vld [vmem:[#allocation2 + $0xd8] ss:$2 sm:$0xff]  ;;  %v2013_v19 = vld [vmem:[#allocation2 + $0xd9] ss:$2 sm:$0xff] }
 0x2fb   : > { %v1847_v44 = vmax.f32 %v2852_v22, 0.0  ;;  %2164 = vrot.lane.b32.xlu1 %v1997_v16, %s3034_s4  ;;  %v2029_v13 = vld [vmem:[#allocation2 + $0xda] ss:$2 sm:$0xff]  ;;  %v2063_v22 = vld [vmem:[#allocation2 + $0x121] ss:$2 sm:$0xff] }
 0x2fc   : > { %v1783_v12 = vpop.f32.mrf.mxu1 }
 0x2fd   : > { %1935 = vst.msk [vmem:[#allocation2 + $0x141] sm:$0xff] %vm1227_vm3, %v1847_v44  ;;  %v1846_v51 = vmax.f32 %v1783_v12, 0.0  ;;  %v2195_v40 = vpop.permute.xlu1 %2194  ;;  %v2163_v14 = vpop.permute.xlu0 %2162 }
 0x2fe   : > { %v2359_v28 = vsel %vm1293_vm5, %v2351_v49, %v2163_v14 }
 0x2ff   : > { %1934 = vst.msk [vmem:[#allocation2 + $0x139] sm:$0xff] %vm1227_vm3, %v1846_v51  ;;  %2288 = vrot.lane.b32.xlu1 %v2057_v36, %s3038_s20  ;;  %v4802_v54 = vsel %vm1326_vm6, %v2359_v28, %v2195_v40  ;;  %v2079_v51 = vld [vmem:[#allocation2 + $0x122] ss:$2 sm:$0xff] }
 0x301   : > { %v2319_v6 = vpop.permute.xlu1 %2318 }
 0x302   : > { %v2287_v33 = vpop.permute.xlu0 %2286 }
 0x303   : > { %v2389_v0 = vsel %vm1425_vm9, %v2381_v46, %v2287_v33  ;;  %2196 = vrot.lane.b32.xlu1 %v2013_v19, %s3035_s5 }
 0x304   : > { %v2397_v43 = vsel %vm1458_vm10, %v2389_v0, %v2319_v6 }
 0x305   : > { %2873 = vmatmul.mubr.msk.f32.vlgmr.msra.gmra.mxu1 %vm1496_vm11, %v2397_v43 }
 0x306   : > { %v2001_v56 = vld [vmem:[#allocation2 + $0x138] ss:$2 sm:$0xff]  ;;  %v2017_v3 = vld [vmem:[#allocation2 + $0x139] ss:$2 sm:$0xff] }
 0x307   : > { %2320 = vrot.lane.b32.xlu1 %v2073_v18, %s3039_s8  ;;  %v2033_v23 = vld [vmem:[#allocation2 + $0x13a] ss:$2 sm:$0xff] }
 0x30b   : > { %2198 = vrot.lane.b32.xlu1 %v2015_v39, %s3035_s5 }
 0x30f   : > { %2322 = vrot.lane.b32.xlu1 %v2075_v8, %s3039_s8 }
 0x313   : > { %2136 = vrot.lane.b32.xlu1 %v1986_v32, %s3033_s30 }
 0x31b   : > { %v2843_v31 = vpop.f32.mrf.mxu0 }
 0x31c   : > { %v1841_v48 = vmax.f32 %v2843_v31, 0.0 }
 0x31d   : > { %v1753_v61 = vpop.f32.mrf.mxu0 }
 0x31e   : > { %1929 = vst.msk [vmem:[#allocation2 + $0xf9] sm:$0xff] %vm1227_vm3, %v1841_v48  ;;  %v1840_v59 = vmax.f32 %v1753_v61, 0.0 }
 0x320   : > { %1928 = vst.msk [vmem:[#allocation2 + $0xf1] sm:$0xff] %vm1227_vm3, %v1840_v59 }
 0x322   : > { %v2855_v50 = vpop.f32.mrf.mxu1 }
 0x323   : > { %v1849_v10 = vmax.f32 %v2855_v50, 0.0 }
 0x324   : > { %v1793_v29 = vpop.f32.mrf.mxu1 }
 0x325   : > { %1937 = vst.msk [vmem:[#allocation2 + $0x159] sm:$0xff] %vm1227_vm3, %v1849_v10  ;;  %v1848_v34 = vmax.f32 %v1793_v29, 0.0 }
 0x327   : > { %1936 = vst.msk [vmem:[#allocation2 + $0x151] sm:$0xff] %vm1227_vm3, %v1848_v34  ;;  %v2045_v37 = vld [vmem:[#allocation2 + $0xf0] ss:$2 sm:$0xff]  ;;  %v1968_v20 = vld [vmem:[#allocation2 + $0xf1] ss:$2 sm:$0xff] }
 0x328   : > { %2260 = vrot.lane.b32.xlu1 %v2045_v37, %s3037_s7  ;;  %2102 = vrot.lane.b32.xlu0 %v1968_v20, %s3032_s29  ;;  %v2061_v17 = vld [vmem:[#allocation2 + $0xf1] ss:$2 sm:$0xff]  ;;  %v1984_v62 = vld [vmem:[#allocation2 + $0xf2] ss:$2 sm:$0xff] }
 0x329   : > { %v2077_v9 = vld [vmem:[#allocation2 + $0xf2] ss:$2 sm:$0xff] }
 0x32c   : > { %2168 = vrot.lane.b32.xlu1 %v2001_v56, %s3034_s4  ;;  %2226 = vrot.lane.b32.xlu0 %v2027_v30, %s3036_s6 }
 0x32e   : > { %v1972_v57 = vld [vmem:[#allocation2 + $0x151] ss:$2 sm:$0xff]  ;;  %v1988_v45 = vld [vmem:[#allocation2 + $0x152] ss:$2 sm:$0xff] }
 0x32f   : > { %v2049_v14 = vld [vmem:[#allocation2 + $0x150] ss:$2 sm:$0xff]  ;;  %v2065_v36 = vld [vmem:[#allocation2 + $0x151] ss:$2 sm:$0xff] }
 0x330   : > { %2292 = vrot.lane.b32.xlu1 %v2061_v17, %s3038_s20  ;;  %2134 = vrot.lane.b32.xlu0 %v1984_v62, %s3033_s30  ;;  %v2081_v6 = vld [vmem:[#allocation2 + $0x152] ss:$2 sm:$0xff] }
 0x334   : > { %2200 = vrot.lane.b32.xlu1 %v2017_v3, %s3035_s5  ;;  %2258 = vrot.lane.b32.xlu0 %v2043_v42, %s3037_s7 }
 0x335   : > { %v2133_v7 = vpop.permute.xlu1 %2132  ;;  %v2101_v1 = vpop.permute.xlu0 %2100 }
 0x336   : > { %v2344_v27 = vsel %vm1227_vm3, %v1950_v58, %v2101_v1 }
 0x337   : > { %v2352_v55 = vsel %vm1260_vm4, %v2344_v27, %v2133_v7 }
 0x338   : > { %2324 = vrot.lane.b32.xlu1 %v2077_v9, %s3039_s8  ;;  %2166 = vrot.lane.b32.xlu0 %v1999_v24, %s3034_s4 }
 0x339   : > { %v2257_v28 = vpop.permute.xlu1 %2256  ;;  %v2225_v33 = vpop.permute.xlu0 %2224 }
 0x33a   : > { %v2374_v19 = vsel %vm1359_vm7, %v4777_v41, %v2225_v33 }
 0x33b   : > { %v2382_v18 = vsel %vm1392_vm8, %v2374_v19, %v2257_v28 }
 0x33c   : > { %2232 = vrot.lane.b32.xlu1 %v2033_v23, %s3036_s6  ;;  %2290 = vrot.lane.b32.xlu0 %v2059_v15, %s3038_s20 }
 0x340   : > { %2104 = vrot.lane.b32.xlu0 %v1970_v35, %s3032_s29 }
 0x343   : > { %v2858_v4 = vpop.f32.mrf.mxu1 }
 0x344   : > { %v1851_v25 = vmax.f32 %v2858_v4, 0.0  ;;  %2228 = vrot.lane.b32.xlu0 %v2029_v13, %s3036_s6 }
 0x345   : > { %v1803_v53 = vpop.f32.mrf.mxu1 }
 0x346   : > { %1939 = vst.msk [vmem:[#allocation2 + $0x171] sm:$0xff] %vm1227_vm3, %v1851_v25  ;;  %v1850_v21 = vmax.f32 %v1803_v53, 0.0 }
 0x348   : > { %1938 = vst.msk [vmem:[#allocation2 + $0x169] sm:$0xff] %vm1227_vm3, %v1850_v21  ;;  %2106 = vrot.lane.b32.xlu0 %v1972_v57, %s3032_s29  ;;  %v1952_v57 = vld [vmem:[#allocation2 + $0xf0] ss:$2 sm:$0xff]  ;;  %s161_s29 = sand.u32 1, %s3022_s13  }
 0x349   : > { %s2584_s28 = scalar_lea.sflag [#allocation4], %s161_s29 }
 0x34c   : > { %2230 = vrot.lane.b32.xlu0 %v2031_v11, %s3036_s6 }
 0x34f   : > { %v2035_v47 = vld [vmem:[#allocation2 + $0x16a] ss:$2 sm:$0xff]  ;;  %v2019_v44 = vld [vmem:[#allocation2 + $0x169] ss:$2 sm:$0xff] }
 0x350   : > { %2138 = vrot.lane.b32.xlu0 %v1988_v45, %s3033_s30  ;;  %2234 = vrot.lane.b32.xlu1 %v2035_v47, %s3036_s6  ;;  %v2861_v49 = vpop.f32.mrf.mxu1  ;;  %v2003_v63 = vld [vmem:[#allocation2 + $0x168] ss:$2 sm:$0xff]  ;;  %s2706_s30 = sshll.u32 %s161_s29, 3 }
 0x351   : > { %v1853_v38 = vmax.f32 %v2861_v49, 0.0 }
 0x352   : > { %v1813_v60 = vpop.f32.mrf.mxu1 }
 0x353   : > { %1941 = vst.msk [vmem:[#allocation2 + $0x189] sm:$0xff] %vm1227_vm3, %v1853_v38  ;;  %v1852_v52 = vmax.f32 %v1813_v60, 0.0 }
 0x354   : > { %2262 = vrot.lane.b32.xlu0 %v2047_v5, %s3037_s7  ;;  %v1954_v5 = vld [vmem:[#allocation2 + $0x120] ss:$2 sm:$0xff] }
 0x355   : > { %1940 = vst.msk [vmem:[#allocation2 + $0x181] sm:$0xff] %vm1227_vm3, %v1852_v52 }
 0x358   : > { %2170 = vrot.lane.b32.xlu0 %v2003_v63, %s3034_s4  ;;  %s2751_s4 = sshll.u32 %s3083_s16, 7  ;;  %s2976_s16 = scalar_lea.vmem %s2975_s11, 256 }
 0x35c   : > { %2294 = vrot.lane.b32.xlu0 %v2063_v22, %s3038_s20  ;;  %v2051_v16 = vld [vmem:[#allocation2 + $0x180] ss:$2 sm:$0xff]  ;;  %v2067_v12 = vld [vmem:[#allocation2 + $0x181] ss:$2 sm:$0xff] }
 0x35d   : > { %2266 = vrot.lane.b32.xlu1 %v2051_v16, %s3037_s7  ;;  %v2083_v40 = vld [vmem:[#allocation2 + $0x182] ss:$2 sm:$0xff] }
 0x35e   : > { %v1956_v16 = vld [vmem:[#allocation2 + $0x150] ss:$2 sm:$0xff] }
 0x360   : > { %2202 = vrot.lane.b32.xlu0 %v2019_v44, %s3035_s5  ;;  %s163_s5 = scalar_lea.vmem [#allocation3], %s2706_s30 }
 0x361   : > { %2298 = vrot.lane.b32.xlu1 %v2067_v12, %s3038_s20  ;;  %s2597_s6 = sshll.u32 %s163_s5, 4  ;;  %s2598_s6 = int_to_ptr.vmem [resolvable:$true] %s2597_s6 }
 0x362   : > { %s2970_s9 = scalar_lea.vmem %s2598_s6, 128  ;;  %p2977_p0 = scmp.lt.s32.totalorder %s2598_s6, %s2975_s11 }
 0x363   : > { %p2971_p11 = scmp.ne.s32.totalorder %s2598_s6, %s2970_s9  ;;  %p2978_p1 = scmp.lt.s32.totalorder %s2976_s16, %s2970_s9 }
 0x364   : > { %2326 = vrot.lane.b32.xlu0 %v2079_v51, %s3039_s8 }
 0x365   : > { %2330 = vrot.lane.b32.xlu1 %v2083_v40, %s3039_s8  ;;  %p2972_p12 = pnand %p2971_p11, %p3100_p5  ;;  %p2979_p2 = por %p2978_p1, %p2977_p0 }
 0x367   : > { %p2973_p13 = pneg %p2972_p12 }
 0x368   : > { %2264 = vrot.lane.b32.xlu0 %v2049_v14, %s3037_s7 }
 0x369   : > { %p2980_p3 = pnand %p2979_p2, %p2973_p13 }
 0x36c   : > { %2296 = vrot.lane.b32.xlu0 %v2065_v36, %s3038_s20 }
 0x36d   : > { %v2165_v26 = vpop.permute.xlu1 %2164 }
 0x36e   : > { %v2360_v2 = vsel %vm1293_vm5, %v2352_v55, %v2165_v26 }
 0x370   : > { %2328 = vrot.lane.b32.xlu0 %v2081_v6, %s3039_s8  ;;  %s4906_s8 = scalar_lea.hbm %s4944_s3, %s2751_s4 }
 0x371   : > { %v2289_v46 = vpop.permute.xlu1 %2288 }
 0x372   : > { %v2390_v39 = vsel %vm1425_vm9, %v2382_v18, %v2289_v46 }
 0x375   : > { %v2197_v0 = vpop.permute.xlu1 %2196 }
 0x376   : > { %v2368_v43 = vsel %vm1326_vm6, %v2360_v2, %v2197_v0 }
 0x379   : > { %v2321_v8 = vpop.permute.xlu1 %2320 }
 0x37a   : > { %v2398_v32 = vsel %vm1458_vm10, %v2390_v39, %v2321_v8 }
 0x37b   : > { %2875 = vmatprep.mubr.msk.f32.mxu1 %vm1496_vm11, %v2398_v32 }
 0x37d   : > { %v2199_v31 = vpop.permute.xlu1 %2198 }
 0x381   : > { %v2323_v48 = vpop.permute.xlu1 %2322 }
 0x385   : > { %v2137_v59 = vpop.permute.xlu1 %2136 }
 0x39a   : > { %v2103_v61 = vpop.permute.xlu0 %2102  ;;  %v2261_v10 = vpop.permute.xlu1 %2260 }
 0x39b   : > { %v2345_v45 = vsel %vm1227_vm3, %v1952_v57, %v2103_v61 }
 0x39e   : > { %v2227_v50 = vpop.permute.xlu0 %2226  ;;  %v2169_v34 = vpop.permute.xlu1 %2168 }
 0x39f   : > { %v2375_v20 = vsel %vm1359_vm7, %v4802_v54, %v2227_v50 }
 0x3a2   : > { %v2135_v29 = vpop.permute.xlu0 %2134  ;;  %v2293_v56 = vpop.permute.xlu1 %2292 }
 0x3a3   : > { %v2353_v49 = vsel %vm1260_vm4, %v2345_v45, %v2135_v29 }
 0x3a6   : > { %v2259_v41 = vpop.permute.xlu0 %2258  ;;  %v2201_v7 = vpop.permute.xlu1 %2200 }
 0x3a7   : > { %v2383_v30 = vsel %vm1392_vm8, %v2375_v20, %v2259_v41 }
 0x3aa   : > { %v2167_v37 = vpop.permute.xlu0 %2166  ;;  %v2325_v9 = vpop.permute.xlu1 %2324 }
 0x3ab   : > { %v2361_v38 = vsel %vm1293_vm5, %v2353_v49, %v2167_v37 }
 0x3ac   : > { %v2369_v63 = vsel %vm1326_vm6, %v2361_v38, %v2199_v31 }
 0x3ae   : > { %v2291_v17 = vpop.permute.xlu0 %2290  ;;  %v2233_v11 = vpop.permute.xlu1 %2232 }
 0x3af   : > { %v2391_v62 = vsel %vm1425_vm9, %v2383_v30, %v2291_v17 }
 0x3b0   : > { %v2399_v3 = vsel %vm1458_vm10, %v2391_v62, %v2323_v48 }
 0x3b1   : > { %2876 = vmatmul.mubr.msk.f32.gmra.mxu1 %vm1496_vm11, %v2399_v3 }
 0x3b2   : > { %v2105_v42 = vpop.permute.xlu0 %2104 }
 0x3b3   : > { %v2346_v22 = vsel %vm1227_vm3, %v1954_v5, %v2105_v42 }
 0x3b4   : > { %v2354_v26 = vsel %vm1260_vm4, %v2346_v22, %v2137_v59 }
 0x3b5   : > { %v2362_v33 = vsel %vm1293_vm5, %v2354_v26, %v2169_v34 }
 0x3b6   : > { %v2229_v58 = vpop.permute.xlu0 %2228  ;;  %v2370_v18 = vsel %vm1326_vm6, %v2362_v33, %v2201_v7 }
 0x3b7   : > { %v2376_v1 = vsel %vm1359_vm7, %v2368_v43, %v2229_v58  ;;  %v2378_v32 = vsel %vm1359_vm7, %v2370_v18, %v2233_v11 }
 0x3b8   : > { %v2384_v27 = vsel %vm1392_vm8, %v2376_v1, %v2261_v10 }
 0x3b9   : > { %v2392_v54 = vsel %vm1425_vm9, %v2384_v27, %v2293_v56 }
 0x3ba   : > { %v2107_v24 = vpop.permute.xlu0 %2106  ;;  %v2400_v55 = vsel %vm1458_vm10, %v2392_v54, %v2325_v9 }
 0x3bb   : > { %2878 = vmatprep.mubr.msk.f32.mxu1 %vm1496_vm11, %v2400_v55  ;;  %v2347_v12 = vsel %vm1227_vm3, %v1956_v16, %v2107_v24 }
 0x3be   : > { %v2231_v23 = vpop.permute.xlu0 %2230 }
 0x3bf   : > { %v2377_v44 = vsel %vm1359_vm7, %v2369_v63, %v2231_v23 }
 0x3c2   : > { %v2139_v15 = vpop.permute.xlu0 %2138  ;;  %v2235_v60 = vpop.permute.xlu1 %2234 }
 0x3c3   : > { %v2355_v14 = vsel %vm1260_vm4, %v2347_v12, %v2139_v15 }
 0x3c5   : > { %v2874_v35 = vpop.f32.mrf.mxu1 }
 0x3c6   : > { %v2263_v4 = vpop.permute.xlu0 %2262  ;;  %v2542_v21 = vmax.f32 %v2874_v35, 0.0 }
 0x3c7   : > { %v2502_v13 = vpop.f32.mrf.mxu1  ;;  %v2385_v51 = vsel %vm1392_vm8, %v2377_v44, %v2263_v4 }
 0x3c8   : > { %v2541_v25 = vmax.f32 %v2502_v13, 0.0 }
 0x3ca   : > { %2549 = vxpose.xlu0.b32.start [1/8] (short) (narrow) %v2541_v25, 8  ;;  %v2171_v53 = vpop.permute.xlu0 %2170 }
 0x3cb   : > { %v2363_v2 = vsel %vm1293_vm5, %v2355_v14, %v2171_v53 }
 0x3ce   : > { %2550 = vxpose.xlu0.b32.cont [2/8] (short) (narrow) %v2542_v21, 8  ;;  %v2295_v47 = vpop.permute.xlu0 %2294 }
 0x3cf   : > { %v2267_v40 = vpop.permute.xlu1 %2266  ;;  %v2393_v28 = vsel %vm1425_vm9, %v2385_v51, %v2295_v47 }
 0x3d2   : > { %v2203_v52 = vpop.permute.xlu0 %2202 }
 0x3d3   : > { %v2371_v46 = vsel %vm1326_vm6, %v2363_v2, %v2203_v52  ;;  %v2299_v43 = vpop.permute.xlu1 %2298 }
 0x3d4   : > { %v2379_v0 = vsel %vm1359_vm7, %v2371_v46, %v2235_v60 }
 0x3d5   : > { %v2387_v39 = vsel %vm1392_vm8, %v2379_v0, %v2267_v40 }
 0x3d6   : > { %v2327_v36 = vpop.permute.xlu0 %2326  ;;  %v2395_v31 = vsel %vm1425_vm9, %v2387_v39, %v2299_v43 }
 0x3d7   : > { %v2401_v6 = vsel %vm1458_vm10, %v2393_v28, %v2327_v36  ;;  %v2331_v48 = vpop.permute.xlu1 %2330 }
 0x3d8   : > { %2879 = vmatmul.mubr.msk.f32.gmra.mxu1 %vm1496_vm11, %v2401_v6  ;;  %v2403_v29 = vsel %vm1458_vm10, %v2395_v31, %v2331_v48 }
 0x3da   : > { %v2265_v19 = vpop.permute.xlu0 %2264 }
 0x3db   : > { %v2386_v61 = vsel %vm1392_vm8, %v2378_v32, %v2265_v19 }
 0x3de   : > { %v2297_v8 = vpop.permute.xlu0 %2296 }
 0x3df   : > { %v2394_v59 = vsel %vm1425_vm9, %v2386_v61, %v2297_v8 }
 0x3e2   : > { %v2329_v50 = vpop.permute.xlu0 %2328 }
 0x3e3   : > { %v2402_v10 = vsel %vm1458_vm10, %v2394_v59, %v2329_v50 }
 0x3e4   : > { %2881 = vmatprep.mubr.msk.f32.mxu1 %vm1496_vm11, %v2402_v10 }
 0x3e5   : > { %2882 = vmatmul.mubr.msk.f32.gmra.mxu1 %vm1496_vm11, %v2403_v29 }
 0x471   : > { %v2877_v41 = vpop.f32.mrf.mxu1 }
 0x472   : > { %v2544_v20 = vmax.f32 %v2877_v41, 0.0 }
 0x473   : > { %v2512_v34 = vpop.f32.mrf.mxu1 }
 0x474   : > { %v2543_v37 = vmax.f32 %v2512_v34, 0.0 }
 0x476   : > { %2551 = vxpose.xlu0.b32.cont [3/8] (short) (narrow) %v2543_v37, 8 }
 0x47a   : > { %2552 = vxpose.xlu0.b32.cont [4/8] (short) (narrow) %v2544_v20, 8 }
 0x498   : > { %v2880_v56 = vpop.f32.mrf.mxu1 }
 0x499   : > { %v2546_v62 = vmax.f32 %v2880_v56, 0.0 }
 0x49a   : > { %v2522_v30 = vpop.f32.mrf.mxu1 }
 0x49b   : > { %v2545_v17 = vmax.f32 %v2522_v30, 0.0 }
 0x49d   : > { %2553 = vxpose.xlu0.b32.cont [5/8] (short) (narrow) %v2545_v17, 8 }
 0x4a1   : > { %2554 = vxpose.xlu0.b32.cont [6/8] (short) (narrow) %v2546_v62, 8 }
 0x4a5   : > { %v2883_v3 = vpop.f32.mrf.mxu1 }
 0x4a6   : > { %v2548_v58 = vmax.f32 %v2883_v3, 0.0 }
 0x4a7   : > { %v2532_v42 = vpop.f32.mrf.mxu1 }
 0x4a8   : > { %v2547_v7 = vmax.f32 %v2532_v42, 0.0 }
 0x4aa   : > { %2555 = vxpose.xlu0.b32.cont [7/8] (short) (narrow) %v2547_v7, 8 }
 0x4ae   : > { %2556 = vxpose.xlu0.b32.end [8/8] (short) (narrow) %v2548_v58, 8 }
 0x50e   : > { %v2565_v1 = vpop.trf.xlu0 }
 0x50f   : > { %2582 = vst.msk [vmem:[%s163_s5] sm:$0xff] %vm2581_vm13, %v2565_v1 }
 0x510   : > { %2983 = shalt.err (!%p2980_p3)
}
 0x511   : > { %s2984_s17 = scalar_lea.hbm %s4906_s8, 128  ;;  %s2988_s25 = scalar_lea.hbm %s4944_s3, 256 }
 0x512   : > { %p2985_p4 = scmp.ne.s32.totalorder %s4906_s8, %s2984_s17  ;;  %p2989_p9 = scmp.lt.s32.totalorder %s4906_s8, %s4944_s3 }
 0x513   : > { %p2990_p10 = scmp.lt.s32.totalorder %s2988_s25, %s2984_s17 }
 0x514   : > { %p2986_p7 = pnand %p2985_p4, %p3100_p5 }
 0x515   : > { %p2991_p11 = por %p2990_p10, %p2989_p9 }
 0x516   : > { %p2987_p8 = pneg %p2986_p7 }
 0x518   : > { %p2992_p12 = pnand %p2991_p11, %p2987_p8 }
 0x51a   : > { %2995 = shalt.err (!%p2992_p12)
}
 0x51b   : > { %2895 = dma.vmem_to_hbm [thread:$0]  (%p3100_p5), %s2598_s6, 128, %s4906_s8, %s2584_s28  }
 0x51c PF: > { %p2901_p13 = scmp.ge.s32.totalorder %s3030_s15, 2  ;;  %s2609_s29 = sand.u32 1, %s3018_s12  }
 0x51d   : > { %s2610_s30 = scalar_lea.sflag [#allocation4], %s2609_s29 }
 0x51e   : > { %p2898_p0 = pnand %p2901_p13, %p3104_p6 }
 0x520   : > { %p2899_p1 = pneg %p2898_p0 }
 0x522   : > { %3013 = dma.done.wait (%p2899_p1), %s2610_s30, 128  }
 0x523   : > { %3015 = vsyncadd (%p2899_p1), %s2610_s30, 4294967168  ;;  %p13_p2 = scmp.ge.s32.totalorder %s3087_s18, 4   ;;  %s5027_s12 = smov %s3022_s13 }
 0x524   : > { %s5028_s13 = smov %s3026_s14  ;;  %s5029_s14 = smov %s3098_s21 }
 0x525   : > { %s5030_s15 = smov %s3087_s18  ;;  %15 = sbr.rel (!%p13_p2) target bundleno = 3 (0x3), region = 138 }
 0x52a   :  { %2615 = vsyncpa [#allocation4], 1 }
 0x52b   :  { %2617 = vsyncpa [#allocation4 + $0x1], 1 }

</bundles_post_ra>
